<compile_context>
chip_gen: v7x
topology: tpu7x:2x2x1
jax: 0.10.0
libtpu: 0.0.40
codegen_flags: <defaults>
</compile_context>

<pallas_src>
import functools

import numpy as np

import jax
import jax.numpy as jnp
from jax import lax
from jax.experimental import pallas as pl
from jax.experimental.pallas import tpu as pltpu


def _psf_loss_kernel(x_ref, t_ref, l_ref, c_ref, out_ref, *, kh, use_mse):
    x = x_ref[...]                       # (H, W) prediction
    t = t_ref[...]                       # (th, tw) target
    th, tw = t.shape

    def msum(a):
        # Full 2-D sum.  Contract the sublane axis on the MXU (ones(8, R) @ a),
        # leaving only a tiny (8, C) lane reduce on the XLU.
        r = a.shape[0]
        cs = lax.dot_general(jnp.ones((8, r), jnp.float32), a,
                             (((1,), (0,)), ((), ())),
                             preferred_element_type=jnp.float32)      # (8, C)
        return (jnp.sum(cs, axis=1, keepdims=True).sum(axis=0, keepdims=True)
                * 0.125)                                              # (1, 1)

    # ---- PSF conv + downsample + crop: kh pairs of MXU matmuls.
    y = jnp.zeros((th, tw), jnp.float32)
    for dy in range(kh):
        tmp = jnp.dot(l_ref[dy], x, preferred_element_type=jnp.float32)      # (th, W)
        y = y + jnp.dot(tmp, c_ref[dy], preferred_element_type=jnp.float32)  # (th, tw)

    diff = y - t
    psf_sum = msum(diff * diff) if use_mse else msum(jnp.abs(diff))

    # ---- TV / Hessian / L1 regularisers on the raw prediction, each term
    # reduced immediately to keep vreg pressure low.
    s_l1 = msum(jnp.abs(x))
    x_d = x[:, :-1] - x[:, 1:]           # (H, W-1)
    s_xd = msum(x_d * x_d)
    xx = x_d[:, :-1] - x_d[:, 1:]        # (H, W-2)
    s_xx = msum(xx * xx)
    xy = x_d[:-1, :] - x_d[1:, :]        # (H-1, W-1); mathematically == yx
    s_xy = msum(xy * xy)
    y_d = x[:-1, :] - x[1:, :]           # (H-1, W)
    s_yd = msum(y_d * y_d)
    yy = y_d[:-1, :] - y_d[1:, :]        # (H-2, W)
    s_yy = msum(yy * yy)

    # Lane-dense (1, 128) output row; lanes 0..6 carry the partial sums.
    sums = (psf_sum, s_xx, s_yy, s_xy, s_xd, s_yd, s_l1)
    lane = lax.broadcasted_iota(jnp.int32, (1, 128), 1)
    row = jnp.zeros((1, 128), jnp.float32)
    for i, s in enumerate(sums):
        row = row + jnp.where(lane == i, s, 0.0)
    out_ref[...] = row


def psf_convolution_loss(y_pred, y_true, psf, *, tv_weight=0.0,
                         hessian_weight=0.02, l1_weight=0.0, use_mse=False,
                         upsample_flag=True, insert_xy=16):
    B, C, H, W = y_pred.shape
    Bt, Ct, th, tw = y_true.shape
    assert C == 1 and Ct == 1 and Bt == B, "PSF conv (1,1,kh,kw) implies C == 1"
    kh, kw = int(psf.shape[-2]), int(psf.shape[-1])
    ph, pw = kh // 2, kw // 2
    scale = 2 if upsample_flag else 1
    Hh, Wh = H // scale, W // scale

    if insert_xy > 0:
        csh, csw = (Hh - th) // 2, (Wh - tw) // 2
        # TODO(synk): the bilinear-resize fallback (crop-size mismatch) is not implemented.
        assert 0 <= csh and 0 <= csw and csh + th <= Hh and csw + tw <= Wh
    else:
        assert Hh == th and Wh == tw, "insert_xy == 0 requires matching sizes"
        csh = csw = 0

    psf2d = psf.reshape(kh, kw).astype(jnp.float32)

    # Row operator L[dy] (th, H): vertical PSF offset + vertical pooling + row
    # crop.  Column selector sel[dx] (W, tw): horizontal offset + horizontal
    # pooling + column crop; contracted with the PSF rows to give C[dy].
    # Out-of-range indices are dropped, which is exactly the 'same' zero pad.
    L_np = np.zeros((kh, th, H), np.float32)
    for dy in range(kh):
        for i in range(th):
            for a in range(scale):
                r = scale * (csh + i) + a + dy - ph
                if 0 <= r < H:
                    L_np[dy, i, r] += 1.0 / scale
    sel_np = np.zeros((kw, W, tw), np.float32)
    for dx in range(kw):
        for j in range(tw):
            for b in range(scale):
                c = scale * (csw + j) + b + dx - pw
                if 0 <= c < W:
                    sel_np[dx, c, j] += 1.0 / scale
    L = jnp.asarray(L_np)
    Cmat = jnp.einsum('yx,xcj->ycj', psf2d, jnp.asarray(sel_np),
                      precision=lax.Precision.HIGHEST)

    x = y_pred.reshape(B, H, W).astype(jnp.float32)
    t = y_true.reshape(B, th, tw).astype(jnp.float32)

    kernel = functools.partial(_psf_loss_kernel, kh=kh, use_mse=use_mse)

    # NOTE: at production frame sizes, add a row-strip grid axis with a (kh-1)
    # halo (and set vmem_limit_bytes) so the per-step working set stays well
    # under v7x's 64 MiB VMEM; at 128x128 a full frame per step is ~64 KiB.
    partial_sums = pl.pallas_call(
        kernel,
        out_shape=jax.ShapeDtypeStruct((B, 1, 128), jnp.float32),
        grid_spec=pltpu.PrefetchScalarGridSpec(
            num_scalar_prefetch=0,
            grid=(B,),
            in_specs=[
                pl.BlockSpec((None, H, W), lambda b: (b, 0, 0)),     # y_pred
                pl.BlockSpec((None, th, tw), lambda b: (b, 0, 0)),   # y_true
                pl.BlockSpec((kh, th, H), lambda b: (0, 0, 0)),      # L (resident)
                pl.BlockSpec((kh, W, tw), lambda b: (0, 0, 0)),      # C (resident)
            ],
            out_specs=pl.BlockSpec((None, 1, 128), lambda b: (b, 0, 0)),
        ),
        compiler_params=pltpu.CompilerParams(
            dimension_semantics=("parallel",)),   # v7x: batch across 2 TCs
    )(x, t, L, Cmat)

    s = jnp.sum(partial_sums[:, 0, :7], axis=0)
    n = float(B * C)
    psf_loss = s[0] / (n * th * tw)
    xx_m = s[1] / (n * H * (W - 2))
    yy_m = s[2] / (n * (H - 2) * W)
    xy_m = s[3] / (n * (H - 1) * (W - 1))   # == yx_m (identical quantities)
    x_tv = s[4] / (n * H * (W - 1))
    y_tv = s[5] / (n * (H - 1) * W)
    l1 = s[6] / (n * H * W)

    total = psf_loss
    if tv_weight > 0:
        total = total + tv_weight * (x_tv + y_tv)
    if hessian_weight > 0:
        total = total + hessian_weight * (xx_m + yy_m + 2.0 * xy_m)
    if l1_weight > 0:
        total = total + l1_weight * l1
    return total


def _reference_loss(y_pred, y_true, psf, *, tv_weight=0.0, hessian_weight=0.02,
                    l1_weight=0.0, use_mse=False):
    # Pure-JAX reference mirroring the PyTorch forward (default config).
    B, C, H, W = y_pred.shape
    th, tw = y_true.shape[2], y_true.shape[3]
    conv = lax.conv_general_dilated(
        y_pred.astype(jnp.float32), psf.astype(jnp.float32),
        window_strides=(1, 1), padding="SAME",
        dimension_numbers=("NCHW", "OIHW", "NCHW"),
        precision=lax.Precision.HIGHEST)
    down = conv.reshape(B, C, H // 2, 2, W // 2, 2).mean(axis=(3, 5))
    csh, csw = (H // 2 - th) // 2, (W // 2 - tw) // 2
    crop = down[:, :, csh:csh + th, csw:csw + tw]
    if use_mse:
        psf_loss = jnp.mean((crop - y_true) ** 2)
    else:
        psf_loss = jnp.mean(jnp.abs(crop - y_true))
    y_d = y_pred[:, :, :-1, :] - y_pred[:, :, 1:, :]
    x_d = y_pred[:, :, :, :-1] - y_pred[:, :, :, 1:]
    xx = x_d[:, :, :, :-1] - x_d[:, :, :, 1:]
    yy = y_d[:, :, :-1, :] - y_d[:, :, 1:, :]
    xy = y_d[:, :, :, :-1] - y_d[:, :, :, 1:]
    yx = x_d[:, :, :-1, :] - x_d[:, :, 1:, :]
    hess = (jnp.mean(xx ** 2) + jnp.mean(yy ** 2) +
            jnp.mean(xy ** 2) + jnp.mean(yx ** 2))
    tv = jnp.mean(x_d ** 2) + jnp.mean(y_d ** 2)
    l1 = jnp.mean(jnp.abs(y_pred))
    return psf_loss + tv_weight * tv + hessian_weight * hess + l1_weight * l1


if __name__ == "__main__":
    key = jax.random.PRNGKey(0)
    B, C, th, tw, insert_xy = 2, 1, 32, 32, 16
    H = 2 * (th + 2 * insert_xy)   # 128 (upsample_flag=True path)
    W = 2 * (tw + 2 * insert_xy)   # 128

    k1, k2 = jax.random.split(key)
    y_pred = jax.random.normal(k1, (B, C, H, W), jnp.float32)
    y_true = jax.random.normal(k2, (B, C, th, tw), jnp.float32)

    # deterministic 5x5 Gaussian PSF, shape (1, 1, 5, 5), normalised to sum 1
    kh = kw = 5
    yc = jnp.arange(kh, dtype=jnp.float32) - (kh - 1) / 2.0
    xc = jnp.arange(kw, dtype=jnp.float32) - (kw - 1) / 2.0
    g = jnp.exp(-(yc[:, None] ** 2 + xc[None, :] ** 2) / (2.0 * 1.0 ** 2))
    psf = (g / jnp.sum(g)).reshape(1, 1, kh, kw)

    loss = psf_convolution_loss(
        y_pred, y_true, psf,
        tv_weight=0.0, hessian_weight=0.02, l1_weight=0.0,
        use_mse=False, upsample_flag=True, insert_xy=insert_xy)
    loss = jax.block_until_ready(loss)

    ref = jax.block_until_ready(
        _reference_loss(y_pred, y_true, psf, hessian_weight=0.02))
    if not jnp.allclose(loss, ref, rtol=3e-3, atol=1e-3):
        raise AssertionError(f"mismatch: kernel={loss} ref={ref}")
    print("KERNEL_OK")
</pallas_src>

<mosaic_0001>
module attributes {stable_mosaic.version = 11 : i64} {
  func.func @_psf_loss_kernel(%arg0: i32, %arg1: memref<1x128x128xf32, #tpu.memory_space<vmem>>, %arg2: memref<1x32x32xf32, #tpu.memory_space<vmem>>, %arg3: memref<5x32x128xf32, #tpu.memory_space<vmem>>, %arg4: memref<5x128x32xf32, #tpu.memory_space<vmem>>, %arg5: memref<1x1x128xf32, #tpu.memory_space<vmem>>) attributes {dimension_semantics = [#tpu.dimension_semantics<parallel>], iteration_bounds = array<i64: 2>, scalar_prefetch = 0 : i64, scratch_operands = 0 : i64, tpu.core_type = #tpu.core_type<tc>, window_params = [{transform_indices = @transform_0, window_bounds = array<i64: 1, 128, 128>}, {transform_indices = @transform_1, window_bounds = array<i64: 1, 32, 32>}, {pipeline_mode = #tpu.pipeline_mode<synchronous>, transform_indices = @transform_2, window_bounds = array<i64: 5, 32, 128>}, {pipeline_mode = #tpu.pipeline_mode<synchronous>, transform_indices = @transform_3, window_bounds = array<i64: 5, 128, 32>}, {transform_indices = @transform_4, window_bounds = array<i64: 1, 1, 128>}]} {
    %c0 = arith.constant 0 : index
    %c0_0 = arith.constant 0 : index
    %c0_1 = arith.constant 0 : index
    %0 = vector.load %arg1[%c0, %c0_0, %c0_1] : memref<1x128x128xf32, #tpu.memory_space<vmem>>, vector<1x128x128xf32>
    %1 = vector.shape_cast %0 : vector<1x128x128xf32> to vector<128x128xf32>
    %c0_2 = arith.constant 0 : index
    %c0_3 = arith.constant 0 : index
    %c0_4 = arith.constant 0 : index
    %2 = vector.load %arg2[%c0_2, %c0_3, %c0_4] : memref<1x32x32xf32, #tpu.memory_space<vmem>>, vector<1x32x32xf32>
    %3 = vector.shape_cast %2 : vector<1x32x32xf32> to vector<32x32xf32>
    %cst = arith.constant 0.000000e+00 : f32
    %4 = vector.broadcast %cst : f32 to vector<32x32xf32>
    %c0_5 = arith.constant 0 : index
    %c0_6 = arith.constant 0 : index
    %c0_7 = arith.constant 0 : index
    %5 = vector.load %arg3[%c0_5, %c0_6, %c0_7] : memref<5x32x128xf32, #tpu.memory_space<vmem>>, vector<1x32x128xf32>
    %6 = vector.shape_cast %5 : vector<1x32x128xf32> to vector<32x128xf32>
    %cst_8 = arith.constant dense<0.000000e+00> : vector<32x128xf32>
    %7 = tpu.matmul %6, %1, %cst_8 {dimension_numbers = #tpu.dot_dimension_numbers<[1], [0], [0], [1], [0, 0, 1, 1], [], []>} : vector<32x128xf32>, vector<128x128xf32>, vector<32x128xf32> -> vector<32x128xf32>
    %c0_9 = arith.constant 0 : index
    %c0_10 = arith.constant 0 : index
    %c0_11 = arith.constant 0 : index
    %8 = vector.load %arg4[%c0_9, %c0_10, %c0_11] : memref<5x128x32xf32, #tpu.memory_space<vmem>>, vector<1x128x32xf32>
    %9 = vector.shape_cast %8 : vector<1x128x32xf32> to vector<128x32xf32>
    %cst_12 = arith.constant dense<0.000000e+00> : vector<32x32xf32>
    %10 = tpu.matmul %7, %9, %cst_12 {dimension_numbers = #tpu.dot_dimension_numbers<[1], [0], [0], [1], [0, 0, 1, 1], [], []>} : vector<32x128xf32>, vector<128x32xf32>, vector<32x32xf32> -> vector<32x32xf32>
    %11 = arith.addf %4, %10 : vector<32x32xf32>
    %c1 = arith.constant 1 : index
    %c0_13 = arith.constant 0 : index
    %c0_14 = arith.constant 0 : index
    %12 = vector.load %arg3[%c1, %c0_13, %c0_14] : memref<5x32x128xf32, #tpu.memory_space<vmem>>, vector<1x32x128xf32>
    %13 = vector.shape_cast %12 : vector<1x32x128xf32> to vector<32x128xf32>
    %cst_15 = arith.constant dense<0.000000e+00> : vector<32x128xf32>
    %14 = tpu.matmul %13, %1, %cst_15 {dimension_numbers = #tpu.dot_dimension_numbers<[1], [0], [0], [1], [0, 0, 1, 1], [], []>} : vector<32x128xf32>, vector<128x128xf32>, vector<32x128xf32> -> vector<32x128xf32>
    %c1_16 = arith.constant 1 : index
    %c0_17 = arith.constant 0 : index
    %c0_18 = arith.constant 0 : index
    %15 = vector.load %arg4[%c1_16, %c0_17, %c0_18] : memref<5x128x32xf32, #tpu.memory_space<vmem>>, vector<1x128x32xf32>
    %16 = vector.shape_cast %15 : vector<1x128x32xf32> to vector<128x32xf32>
    %cst_19 = arith.constant dense<0.000000e+00> : vector<32x32xf32>
    %17 = tpu.matmul %14, %16, %cst_19 {dimension_numbers = #tpu.dot_dimension_numbers<[1], [0], [0], [1], [0, 0, 1, 1], [], []>} : vector<32x128xf32>, vector<128x32xf32>, vector<32x32xf32> -> vector<32x32xf32>
    %18 = arith.addf %11, %17 : vector<32x32xf32>
    %c2 = arith.constant 2 : index
    %c0_20 = arith.constant 0 : index
    %c0_21 = arith.constant 0 : index
    %19 = vector.load %arg3[%c2, %c0_20, %c0_21] : memref<5x32x128xf32, #tpu.memory_space<vmem>>, vector<1x32x128xf32>
    %20 = vector.shape_cast %19 : vector<1x32x128xf32> to vector<32x128xf32>
    %cst_22 = arith.constant dense<0.000000e+00> : vector<32x128xf32>
    %21 = tpu.matmul %20, %1, %cst_22 {dimension_numbers = #tpu.dot_dimension_numbers<[1], [0], [0], [1], [0, 0, 1, 1], [], []>} : vector<32x128xf32>, vector<128x128xf32>, vector<32x128xf32> -> vector<32x128xf32>
    %c2_23 = arith.constant 2 : index
    %c0_24 = arith.constant 0 : index
    %c0_25 = arith.constant 0 : index
    %22 = vector.load %arg4[%c2_23, %c0_24, %c0_25] : memref<5x128x32xf32, #tpu.memory_space<vmem>>, vector<1x128x32xf32>
    %23 = vector.shape_cast %22 : vector<1x128x32xf32> to vector<128x32xf32>
    %cst_26 = arith.constant dense<0.000000e+00> : vector<32x32xf32>
    %24 = tpu.matmul %21, %23, %cst_26 {dimension_numbers = #tpu.dot_dimension_numbers<[1], [0], [0], [1], [0, 0, 1, 1], [], []>} : vector<32x128xf32>, vector<128x32xf32>, vector<32x32xf32> -> vector<32x32xf32>
    %25 = arith.addf %18, %24 : vector<32x32xf32>
    %c3 = arith.constant 3 : index
    %c0_27 = arith.constant 0 : index
    %c0_28 = arith.constant 0 : index
    %26 = vector.load %arg3[%c3, %c0_27, %c0_28] : memref<5x32x128xf32, #tpu.memory_space<vmem>>, vector<1x32x128xf32>
    %27 = vector.shape_cast %26 : vector<1x32x128xf32> to vector<32x128xf32>
    %cst_29 = arith.constant dense<0.000000e+00> : vector<32x128xf32>
    %28 = tpu.matmul %27, %1, %cst_29 {dimension_numbers = #tpu.dot_dimension_numbers<[1], [0], [0], [1], [0, 0, 1, 1], [], []>} : vector<32x128xf32>, vector<128x128xf32>, vector<32x128xf32> -> vector<32x128xf32>
    %c3_30 = arith.constant 3 : index
    %c0_31 = arith.constant 0 : index
    %c0_32 = arith.constant 0 : index
    %29 = vector.load %arg4[%c3_30, %c0_31, %c0_32] : memref<5x128x32xf32, #tpu.memory_space<vmem>>, vector<1x128x32xf32>
    %30 = vector.shape_cast %29 : vector<1x128x32xf32> to vector<128x32xf32>
    %cst_33 = arith.constant dense<0.000000e+00> : vector<32x32xf32>
    %31 = tpu.matmul %28, %30, %cst_33 {dimension_numbers = #tpu.dot_dimension_numbers<[1], [0], [0], [1], [0, 0, 1, 1], [], []>} : vector<32x128xf32>, vector<128x32xf32>, vector<32x32xf32> -> vector<32x32xf32>
    %32 = arith.addf %25, %31 : vector<32x32xf32>
    %c4 = arith.constant 4 : index
    %c0_34 = arith.constant 0 : index
    %c0_35 = arith.constant 0 : index
    %33 = vector.load %arg3[%c4, %c0_34, %c0_35] : memref<5x32x128xf32, #tpu.memory_space<vmem>>, vector<1x32x128xf32>
    %34 = vector.shape_cast %33 : vector<1x32x128xf32> to vector<32x128xf32>
    %cst_36 = arith.constant dense<0.000000e+00> : vector<32x128xf32>
    %35 = tpu.matmul %34, %1, %cst_36 {dimension_numbers = #tpu.dot_dimension_numbers<[1], [0], [0], [1], [0, 0, 1, 1], [], []>} : vector<32x128xf32>, vector<128x128xf32>, vector<32x128xf32> -> vector<32x128xf32>
    %c4_37 = arith.constant 4 : index
    %c0_38 = arith.constant 0 : index
    %c0_39 = arith.constant 0 : index
    %36 = vector.load %arg4[%c4_37, %c0_38, %c0_39] : memref<5x128x32xf32, #tpu.memory_space<vmem>>, vector<1x128x32xf32>
    %37 = vector.shape_cast %36 : vector<1x128x32xf32> to vector<128x32xf32>
    %cst_40 = arith.constant dense<0.000000e+00> : vector<32x32xf32>
    %38 = tpu.matmul %35, %37, %cst_40 {dimension_numbers = #tpu.dot_dimension_numbers<[1], [0], [0], [1], [0, 0, 1, 1], [], []>} : vector<32x128xf32>, vector<128x32xf32>, vector<32x32xf32> -> vector<32x32xf32>
    %39 = arith.addf %32, %38 : vector<32x32xf32>
    %40 = arith.subf %39, %3 : vector<32x32xf32>
    %41 = math.absf %40 : vector<32x32xf32>
    %cst_41 = arith.constant 1.000000e+00 : f32
    %42 = vector.broadcast %cst_41 : f32 to vector<8x32xf32>
    %cst_42 = arith.constant dense<0.000000e+00> : vector<8x32xf32>
    %43 = tpu.matmul %42, %41, %cst_42 {dimension_numbers = #tpu.dot_dimension_numbers<[1], [0], [0], [1], [0, 0, 1, 1], [], []>} : vector<8x32xf32>, vector<32x32xf32>, vector<8x32xf32> -> vector<8x32xf32>
    %cst_43 = arith.constant dense<0.000000e+00> : vector<8xf32>
    %44 = vector.multi_reduction <add>, %43, %cst_43 [1] : vector<8x32xf32> to vector<8xf32>
    %45 = vector.shape_cast %44 : vector<8xf32> to vector<8x1xf32>
    %cst_44 = arith.constant dense<0.000000e+00> : vector<1xf32>
    %46 = vector.multi_reduction <add>, %45, %cst_44 [0] : vector<8x1xf32> to vector<1xf32>
    %47 = vector.shape_cast %46 : vector<1xf32> to vector<1x1xf32>
    %cst_45 = arith.constant 1.250000e-01 : f32
    %48 = vector.broadcast %cst_45 : f32 to vector<1x1xf32>
    %49 = arith.mulf %47, %48 : vector<1x1xf32>
    %50 = math.absf %1 : vector<128x128xf32>
    %cst_46 = arith.constant 1.000000e+00 : f32
    %51 = vector.broadcast %cst_46 : f32 to vector<8x128xf32>
    %cst_47 = arith.constant dense<0.000000e+00> : vector<8x128xf32>
    %52 = tpu.matmul %51, %50, %cst_47 {dimension_numbers = #tpu.dot_dimension_numbers<[1], [0], [0], [1], [0, 0, 1, 1], [], []>} : vector<8x128xf32>, vector<128x128xf32>, vector<8x128xf32> -> vector<8x128xf32>
    %cst_48 = arith.constant dense<0.000000e+00> : vector<8xf32>
    %53 = vector.multi_reduction <add>, %52, %cst_48 [1] : vector<8x128xf32> to vector<8xf32>
    %54 = vector.shape_cast %53 : vector<8xf32> to vector<8x1xf32>
    %cst_49 = arith.constant dense<0.000000e+00> : vector<1xf32>
    %55 = vector.multi_reduction <add>, %54, %cst_49 [0] : vector<8x1xf32> to vector<1xf32>
    %56 = vector.shape_cast %55 : vector<1xf32> to vector<1x1xf32>
    %cst_50 = arith.constant 1.250000e-01 : f32
    %57 = vector.broadcast %cst_50 : f32 to vector<1x1xf32>
    %58 = arith.mulf %56, %57 : vector<1x1xf32>
    %59 = vector.extract_strided_slice %1 {offsets = [0, 0], sizes = [128, 127], strides = [1, 1]} : vector<128x128xf32> to vector<128x127xf32>
    %60 = vector.extract_strided_slice %1 {offsets = [0, 1], sizes = [128, 127], strides = [1, 1]} : vector<128x128xf32> to vector<128x127xf32>
    %61 = arith.subf %59, %60 : vector<128x127xf32>
    %62 = arith.mulf %61, %61 : vector<128x127xf32>
    %cst_51 = arith.constant 1.000000e+00 : f32
    %63 = vector.broadcast %cst_51 : f32 to vector<8x128xf32>
    %cst_52 = arith.constant dense<0.000000e+00> : vector<8x127xf32>
    %64 = tpu.matmul %63, %62, %cst_52 {dimension_numbers = #tpu.dot_dimension_numbers<[1], [0], [0], [1], [0, 0, 1, 1], [], []>} : vector<8x128xf32>, vector<128x127xf32>, vector<8x127xf32> -> vector<8x127xf32>
    %cst_53 = arith.constant dense<0.000000e+00> : vector<8xf32>
    %65 = vector.multi_reduction <add>, %64, %cst_53 [1] : vector<8x127xf32> to vector<8xf32>
    %66 = vector.shape_cast %65 : vector<8xf32> to vector<8x1xf32>
    %cst_54 = arith.constant dense<0.000000e+00> : vector<1xf32>
    %67 = vector.multi_reduction <add>, %66, %cst_54 [0] : vector<8x1xf32> to vector<1xf32>
    %68 = vector.shape_cast %67 : vector<1xf32> to vector<1x1xf32>
    %cst_55 = arith.constant 1.250000e-01 : f32
    %69 = vector.broadcast %cst_55 : f32 to vector<1x1xf32>
    %70 = arith.mulf %68, %69 : vector<1x1xf32>
    %71 = vector.extract_strided_slice %61 {offsets = [0, 0], sizes = [128, 126], strides = [1, 1]} : vector<128x127xf32> to vector<128x126xf32>
    %72 = vector.extract_strided_slice %61 {offsets = [0, 1], sizes = [128, 126], strides = [1, 1]} : vector<128x127xf32> to vector<128x126xf32>
    %73 = arith.subf %71, %72 : vector<128x126xf32>
    %74 = arith.mulf %73, %73 : vector<128x126xf32>
    %cst_56 = arith.constant 1.000000e+00 : f32
    %75 = vector.broadcast %cst_56 : f32 to vector<8x128xf32>
    %cst_57 = arith.constant dense<0.000000e+00> : vector<8x126xf32>
    %76 = tpu.matmul %75, %74, %cst_57 {dimension_numbers = #tpu.dot_dimension_numbers<[1], [0], [0], [1], [0, 0, 1, 1], [], []>} : vector<8x128xf32>, vector<128x126xf32>, vector<8x126xf32> -> vector<8x126xf32>
    %cst_58 = arith.constant dense<0.000000e+00> : vector<8xf32>
    %77 = vector.multi_reduction <add>, %76, %cst_58 [1] : vector<8x126xf32> to vector<8xf32>
    %78 = vector.shape_cast %77 : vector<8xf32> to vector<8x1xf32>
    %cst_59 = arith.constant dense<0.000000e+00> : vector<1xf32>
    %79 = vector.multi_reduction <add>, %78, %cst_59 [0] : vector<8x1xf32> to vector<1xf32>
    %80 = vector.shape_cast %79 : vector<1xf32> to vector<1x1xf32>
    %cst_60 = arith.constant 1.250000e-01 : f32
    %81 = vector.broadcast %cst_60 : f32 to vector<1x1xf32>
    %82 = arith.mulf %80, %81 : vector<1x1xf32>
    %83 = vector.extract_strided_slice %61 {offsets = [0, 0], sizes = [127, 127], strides = [1, 1]} : vector<128x127xf32> to vector<127x127xf32>
    %84 = vector.extract_strided_slice %61 {offsets = [1, 0], sizes = [127, 127], strides = [1, 1]} : vector<128x127xf32> to vector<127x127xf32>
    %85 = arith.subf %83, %84 : vector<127x127xf32>
    %86 = arith.mulf %85, %85 : vector<127x127xf32>
    %cst_61 = arith.constant 1.000000e+00 : f32
    %87 = vector.broadcast %cst_61 : f32 to vector<8x127xf32>
    %cst_62 = arith.constant dense<0.000000e+00> : vector<8x127xf32>
    %88 = tpu.matmul %87, %86, %cst_62 {dimension_numbers = #tpu.dot_dimension_numbers<[1], [0], [0], [1], [0, 0, 1, 1], [], []>} : vector<8x127xf32>, vector<127x127xf32>, vector<8x127xf32> -> vector<8x127xf32>
    %cst_63 = arith.constant dense<0.000000e+00> : vector<8xf32>
    %89 = vector.multi_reduction <add>, %88, %cst_63 [1] : vector<8x127xf32> to vector<8xf32>
    %90 = vector.shape_cast %89 : vector<8xf32> to vector<8x1xf32>
    %cst_64 = arith.constant dense<0.000000e+00> : vector<1xf32>
    %91 = vector.multi_reduction <add>, %90, %cst_64 [0] : vector<8x1xf32> to vector<1xf32>
    %92 = vector.shape_cast %91 : vector<1xf32> to vector<1x1xf32>
    %cst_65 = arith.constant 1.250000e-01 : f32
    %93 = vector.broadcast %cst_65 : f32 to vector<1x1xf32>
    %94 = arith.mulf %92, %93 : vector<1x1xf32>
    %95 = vector.extract_strided_slice %1 {offsets = [0, 0], sizes = [127, 128], strides = [1, 1]} : vector<128x128xf32> to vector<127x128xf32>
    %96 = vector.extract_strided_slice %1 {offsets = [1, 0], sizes = [127, 128], strides = [1, 1]} : vector<128x128xf32> to vector<127x128xf32>
    %97 = arith.subf %95, %96 : vector<127x128xf32>
    %98 = arith.mulf %97, %97 : vector<127x128xf32>
    %cst_66 = arith.constant 1.000000e+00 : f32
    %99 = vector.broadcast %cst_66 : f32 to vector<8x127xf32>
    %cst_67 = arith.constant dense<0.000000e+00> : vector<8x128xf32>
    %100 = tpu.matmul %99, %98, %cst_67 {dimension_numbers = #tpu.dot_dimension_numbers<[1], [0], [0], [1], [0, 0, 1, 1], [], []>} : vector<8x127xf32>, vector<127x128xf32>, vector<8x128xf32> -> vector<8x128xf32>
    %cst_68 = arith.constant dense<0.000000e+00> : vector<8xf32>
    %101 = vector.multi_reduction <add>, %100, %cst_68 [1] : vector<8x128xf32> to vector<8xf32>
    %102 = vector.shape_cast %101 : vector<8xf32> to vector<8x1xf32>
    %cst_69 = arith.constant dense<0.000000e+00> : vector<1xf32>
    %103 = vector.multi_reduction <add>, %102, %cst_69 [0] : vector<8x1xf32> to vector<1xf32>
    %104 = vector.shape_cast %103 : vector<1xf32> to vector<1x1xf32>
    %cst_70 = arith.constant 1.250000e-01 : f32
    %105 = vector.broadcast %cst_70 : f32 to vector<1x1xf32>
    %106 = arith.mulf %104, %105 : vector<1x1xf32>
    %107 = vector.extract_strided_slice %97 {offsets = [0, 0], sizes = [126, 128], strides = [1, 1]} : vector<127x128xf32> to vector<126x128xf32>
    %108 = vector.extract_strided_slice %97 {offsets = [1, 0], sizes = [126, 128], strides = [1, 1]} : vector<127x128xf32> to vector<126x128xf32>
    %109 = arith.subf %107, %108 : vector<126x128xf32>
    %110 = arith.mulf %109, %109 : vector<126x128xf32>
    %cst_71 = arith.constant 1.000000e+00 : f32
    %111 = vector.broadcast %cst_71 : f32 to vector<8x126xf32>
    %cst_72 = arith.constant dense<0.000000e+00> : vector<8x128xf32>
    %112 = tpu.matmul %111, %110, %cst_72 {dimension_numbers = #tpu.dot_dimension_numbers<[1], [0], [0], [1], [0, 0, 1, 1], [], []>} : vector<8x126xf32>, vector<126x128xf32>, vector<8x128xf32> -> vector<8x128xf32>
    %cst_73 = arith.constant dense<0.000000e+00> : vector<8xf32>
    %113 = vector.multi_reduction <add>, %112, %cst_73 [1] : vector<8x128xf32> to vector<8xf32>
    %114 = vector.shape_cast %113 : vector<8xf32> to vector<8x1xf32>
    %cst_74 = arith.constant dense<0.000000e+00> : vector<1xf32>
    %115 = vector.multi_reduction <add>, %114, %cst_74 [0] : vector<8x1xf32> to vector<1xf32>
    %116 = vector.shape_cast %115 : vector<1xf32> to vector<1x1xf32>
    %cst_75 = arith.constant 1.250000e-01 : f32
    %117 = vector.broadcast %cst_75 : f32 to vector<1x1xf32>
    %118 = arith.mulf %116, %117 : vector<1x1xf32>
    %119 = tpu.iota {dimensions = array<i32: 1>} : vector<1x128xi32>
    %cst_76 = arith.constant 0.000000e+00 : f32
    %120 = vector.broadcast %cst_76 : f32 to vector<1x128xf32>
    %c0_i32 = arith.constant 0 : i32
    %121 = vector.broadcast %c0_i32 : i32 to vector<1x128xi32>
    %122 = arith.cmpi eq, %119, %121 : vector<1x128xi32>
    %cst_77 = arith.constant 0.000000e+00 : f32
    %123 = vector.shape_cast %49 : vector<1x1xf32> to vector<1x1xf32>
    %124 = vector.broadcast %123 : vector<1x1xf32> to vector<1x128xf32>
    %125 = vector.broadcast %cst_77 : f32 to vector<1x128xf32>
    %126 = arith.select %122, %124, %125 : vector<1x128xi1>, vector<1x128xf32>
    %127 = arith.addf %120, %126 : vector<1x128xf32>
    %c1_i32 = arith.constant 1 : i32
    %128 = vector.broadcast %c1_i32 : i32 to vector<1x128xi32>
    %129 = arith.cmpi eq, %119, %128 : vector<1x128xi32>
    %cst_78 = arith.constant 0.000000e+00 : f32
    %130 = vector.shape_cast %82 : vector<1x1xf32> to vector<1x1xf32>
    %131 = vector.broadcast %130 : vector<1x1xf32> to vector<1x128xf32>
    %132 = vector.broadcast %cst_78 : f32 to vector<1x128xf32>
    %133 = arith.select %129, %131, %132 : vector<1x128xi1>, vector<1x128xf32>
    %134 = arith.addf %127, %133 : vector<1x128xf32>
    %c2_i32 = arith.constant 2 : i32
    %135 = vector.broadcast %c2_i32 : i32 to vector<1x128xi32>
    %136 = arith.cmpi eq, %119, %135 : vector<1x128xi32>
    %cst_79 = arith.constant 0.000000e+00 : f32
    %137 = vector.shape_cast %118 : vector<1x1xf32> to vector<1x1xf32>
    %138 = vector.broadcast %137 : vector<1x1xf32> to vector<1x128xf32>
    %139 = vector.broadcast %cst_79 : f32 to vector<1x128xf32>
    %140 = arith.select %136, %138, %139 : vector<1x128xi1>, vector<1x128xf32>
    %141 = arith.addf %134, %140 : vector<1x128xf32>
    %c3_i32 = arith.constant 3 : i32
    %142 = vector.broadcast %c3_i32 : i32 to vector<1x128xi32>
    %143 = arith.cmpi eq, %119, %142 : vector<1x128xi32>
    %cst_80 = arith.constant 0.000000e+00 : f32
    %144 = vector.shape_cast %94 : vector<1x1xf32> to vector<1x1xf32>
    %145 = vector.broadcast %144 : vector<1x1xf32> to vector<1x128xf32>
    %146 = vector.broadcast %cst_80 : f32 to vector<1x128xf32>
    %147 = arith.select %143, %145, %146 : vector<1x128xi1>, vector<1x128xf32>
    %148 = arith.addf %141, %147 : vector<1x128xf32>
    %c4_i32 = arith.constant 4 : i32
    %149 = vector.broadcast %c4_i32 : i32 to vector<1x128xi32>
    %150 = arith.cmpi eq, %119, %149 : vector<1x128xi32>
    %cst_81 = arith.constant 0.000000e+00 : f32
    %151 = vector.shape_cast %70 : vector<1x1xf32> to vector<1x1xf32>
    %152 = vector.broadcast %151 : vector<1x1xf32> to vector<1x128xf32>
    %153 = vector.broadcast %cst_81 : f32 to vector<1x128xf32>
    %154 = arith.select %150, %152, %153 : vector<1x128xi1>, vector<1x128xf32>
    %155 = arith.addf %148, %154 : vector<1x128xf32>
    %c5_i32 = arith.constant 5 : i32
    %156 = vector.broadcast %c5_i32 : i32 to vector<1x128xi32>
    %157 = arith.cmpi eq, %119, %156 : vector<1x128xi32>
    %cst_82 = arith.constant 0.000000e+00 : f32
    %158 = vector.shape_cast %106 : vector<1x1xf32> to vector<1x1xf32>
    %159 = vector.broadcast %158 : vector<1x1xf32> to vector<1x128xf32>
    %160 = vector.broadcast %cst_82 : f32 to vector<1x128xf32>
    %161 = arith.select %157, %159, %160 : vector<1x128xi1>, vector<1x128xf32>
    %162 = arith.addf %155, %161 : vector<1x128xf32>
    %c6_i32 = arith.constant 6 : i32
    %163 = vector.broadcast %c6_i32 : i32 to vector<1x128xi32>
    %164 = arith.cmpi eq, %119, %163 : vector<1x128xi32>
    %cst_83 = arith.constant 0.000000e+00 : f32
    %165 = vector.shape_cast %58 : vector<1x1xf32> to vector<1x1xf32>
    %166 = vector.broadcast %165 : vector<1x1xf32> to vector<1x128xf32>
    %167 = vector.broadcast %cst_83 : f32 to vector<1x128xf32>
    %168 = arith.select %164, %166, %167 : vector<1x128xi1>, vector<1x128xf32>
    %169 = arith.addf %162, %168 : vector<1x128xf32>
    %c0_84 = arith.constant 0 : index
    %c0_85 = arith.constant 0 : index
    %c0_86 = arith.constant 0 : index
    %170 = vector.load %arg5[%c0_84, %c0_85, %c0_86] : memref<1x1x128xf32, #tpu.memory_space<vmem>>, vector<1x1x128xf32>
    %171 = vector.shape_cast %170 : vector<1x1x128xf32> to vector<1x128xf32>
    %172 = vector.shape_cast %169 : vector<1x128xf32> to vector<1x1x128xf32>
    tpu.vector_store %arg5[%c0_84, %c0_85, %c0_86], %172 {strides = array<i32>} : memref<1x1x128xf32, #tpu.memory_space<vmem>>, vector<1x1x128xf32>,
    return
  }
  func.func @transform_0(%arg0: i32) -> (i32, i32, i32) {
    %c0_i32 = arith.constant 0 : i32
    %c0_i32_0 = arith.constant 0 : i32
    %c0_i32_1 = arith.constant 0 : i32
    return %arg0, %c0_i32, %c0_i32_0 : i32, i32, i32
  }
  func.func @transform_1(%arg0: i32) -> (i32, i32, i32) {
    %c0_i32 = arith.constant 0 : i32
    %c0_i32_0 = arith.constant 0 : i32
    %c0_i32_1 = arith.constant 0 : i32
    return %arg0, %c0_i32, %c0_i32_0 : i32, i32, i32
  }
  func.func @transform_2(%arg0: i32) -> (i32, i32, i32) {
    %c0_i32 = arith.constant 0 : i32
    %c0_i32_0 = arith.constant 0 : i32
    %c0_i32_1 = arith.constant 0 : i32
    %c0_i32_2 = arith.constant 0 : i32
    return %c0_i32, %c0_i32_0, %c0_i32_1 : i32, i32, i32
  }
  func.func @transform_3(%arg0: i32) -> (i32, i32, i32) {
    %c0_i32 = arith.constant 0 : i32
    %c0_i32_0 = arith.constant 0 : i32
    %c0_i32_1 = arith.constant 0 : i32
    %c0_i32_2 = arith.constant 0 : i32
    return %c0_i32, %c0_i32_0, %c0_i32_1 : i32, i32, i32
  }
  func.func @transform_4(%arg0: i32) -> (i32, i32, i32) {
    %c0_i32 = arith.constant 0 : i32
    %c0_i32_0 = arith.constant 0 : i32
    %c0_i32_1 = arith.constant 0 : i32
    return %arg0, %c0_i32, %c0_i32_0 : i32, i32, i32
  }
}

</mosaic_0001>

<bundles_post_ra>
// kernel: tpu_custom_call.1
= control target key start
LH: loop header
LB: loop body
LE: loop exit
PB: predicated region body
PF: predicated region fallthrough
CT: control target
= control target key end

     0   :  { %9 = vsyncpa [#allocation3], 0  ;;  %s5154_s0 = inlined_call_operand.vmem [shape: f32[2,128,128], index: 0, kind: input, shape index: {}]   ;;  %s5155_s1 = inlined_call_operand.vmem [shape: f32[2,32,32], index: 1, kind: input, shape index: {}]   ;;  %s5156_s2 = inlined_call_operand.vmem [shape: f32[5,32,128], index: 2, kind: input, shape index: {}]   ;;  %s5157_s3 = inlined_call_operand.vmem [shape: f32[5,128,32], index: 3, kind: input, shape index: {}]   ;;  %s5158_s4 = inlined_call_operand.hbm [shape: f32[2,1,128], index: 4, kind: output, shape index: {}]  }
   0x1   :  { %11 = vsyncpa [#allocation3 + $0x1], 0  ;;  %s4010_s15 = smov 0   ;;  %s4012_s16 = smov 0  }
   0x2   :  { %s4014_s17 = smov 0   ;;  %s4016_s18 = smov 0  }
   0x3 LB: > { %s4031_s19 = sadd.s32 4294967295, %s3976_s18   ;;  %s2356_s20 = sadd.s32 4294967294, %s3976_s18   ;;  %s3976_s18 = sphi %s4016_s18, %s5209_s18   ;;  %s3972_s17 = sphi %s4014_s17, %s5208_s17   ;;  %s3968_s16 = sphi %s4012_s16, %s5207_s16   ;;  %s3964_s15 = sphi %s4010_s15, %s5206_s15  }
   0x4   : > { %s4035_s21 = sadd.s32 1, %s3976_s18   ;;  %s118_s22 = sadd.s32 1, %s3972_s17 }
   0x5   : > { %s115_s23 = ssub.s32 %s3976_s18, %s4035_s21  ;;  %p128_p0 = scmp.ne.s32.totalorder %s3972_s17, %s3968_s16 }
   0x6   : > { %p116_p1 = scmp.eq.s32.totalorder %s115_s23, 0  ;;  %p129_p2 = scmp.eq.s32.totalorder %s4031_s19, 1 }
   0x7   : > { %p134_p3 = scmp.ne.s32.totalorder %s3968_s16, %s3964_s15  ;;  %p135_p4 = scmp.eq.s32.totalorder %s2356_s20, 1 }
   0x8   : > { %s4046_s24 = scalar_select %p116_p1, %s3972_s17, %s118_s22  }
   0x9   : > { %p4048_p5 = por %p129_p2, %p128_p0  ;;  %p4052_p6 = por %p135_p4, %p134_p3 }
   0xa   : > { %p2359_p7 = scmp.ge.s32.totalorder %s3976_s18, 1  ;;  %p175_p8 = scmp.lt.s32.totalorder %s3976_s18, 3 }
   0xc   : > { %p176_p9 = pnand %p2359_p7, %p175_p8 }
   0xe   : > { %179 = sbr.rel (%p176_p9) target bundleno = 1153 (0x481), region = 36 }
  0x15   : > { %p205_p10 = scmp.lt.s32.totalorder %s4031_s19, 1  ;;  %v2364_v0 = vld [vmem:[%s5156_s2 + $0x20] sm:$0xff]  ;;  %v2369_v27 = vld [vmem:[%s5157_s3 + $0x88] sm:$0xff]  ;;  %v2366_v31 = vld [vmem:[%s5156_s2 + $0x30] sm:$0xff]  ;;  %vm3980_vm0 = vmmov 0   ;;  %vm1746_vm1 = vcmask 1046528  }
  0x16   : > { %2833 = vmatprep.mubr.f32.mxu1 %v2364_v0  ;;  %v235_v1 = vld [vmem:[%s5156_s2] sm:$0xff]  ;;  %v2365_v29 = vld [vmem:[%s5156_s2 + $0x28] sm:$0xff]  ;;  %v237_v32 = vld [vmem:[%s5156_s2 + $0x10] sm:$0xff]  ;;  %vm1213_vm2 = vcmask 261120   ;;  %vm3983_vm3 = vmmov 1   ;;  %vm1558_vm5 = vcmask 1039360  }
  0x17   : > { %s4066_s5 = scalar_select %p205_p10, %s4031_s19, 1  ;;  %2795 = vmatprep.mubr.f32.mxu0 %v235_v1  ;;  %v2368_v26 = vld [vmem:[%s5157_s3 + $0x80] sm:$0xff]  ;;  %v236_v30 = vld [vmem:[%s5156_s2 + $0x8] sm:$0xff]  ;;  %v2370_v33 = vld [vmem:[%s5157_s3 + $0x90] sm:$0xff]  ;;  %vm1735_vm6 = vcmask 1031168   ;;  %vm2169_vm7 = vcmask 1045504  }
  0x18   : > { %v3428_v28 = vpack.c.bf16 %v2369_v27, %v2368_v26  ;;  %v2371_v34 = vld [vmem:[%s5157_s3 + $0x98] sm:$0xff]  ;;  %v2372_v37 = vld [vmem:[%s5157_s3 + $0xa0] sm:$0xff]  ;;  %v2373_v38 = vld [vmem:[%s5157_s3 + $0xa8] sm:$0xff]  ;;  %s2451_s30 = sshll.u32 %s4031_s19, 4  ;;  %s3984_s19 = smov [#allocation2]  }
  0x19   : > { %s2454_s6 = sshll.u32 %s4066_s5, 7  ;;  %v2367_v35 = vld [vmem:[%s5156_s2 + $0x38] sm:$0xff]  ;;  %v2384_v39 = vld [vmem:[%s5156_s2 + $0x40] sm:$0xff]  ;;  %v3432_v40 = vpack.c.bf16 %v2371_v34, %v2370_v33  ;;  %v3436_v41 = vpack.c.bf16 %v2373_v38, %v2372_v37  ;;  %v2374_v42 = vld [vmem:[%s5157_s3 + $0xb0] sm:$0xff]  ;;  %s2455_s27 = sshll.u32 %s4066_s5, 5 }
  0x1a   : > { %s4072_s9 = scalar_lea.vmem %s5154_s0, %s2454_s6  ;;  %v238_v36 = vld [vmem:[%s5156_s2 + $0x18] sm:$0xff]  ;;  %v2376_v45 = vld [vmem:[%s5157_s3 + $0xc0] sm:$0xff]  ;;  %v2377_v46 = vld [vmem:[%s5157_s3 + $0xc8] sm:$0xff]  ;;  %s3978_s6 = smov 127  }
  0x1b   : > { %v4075_v2 = vld [vmem:[%s4072_s9] sm:$0xff]  ;;  %v4078_v3 = vld [vmem:[%s4072_s9 + $0x8] sm:$0xff]  ;;  %v4081_v4 = vld [vmem:[%s4072_s9 + $0x10] sm:$0xff]  ;;  %v3444_v47 = vpack.c.bf16 %v2377_v46, %v2376_v45  ;;  %s4833_s29 = scalar_lea.vmem %s5155_s1, %s2455_s27  ;;  %s3918_s14 = sshll.u32 %s3984_s19, 4  ;;  %s3919_s14 = int_to_ptr.vmem [resolvable:$false] %s3918_s14 }
  0x1c   : > { %v4085_v5 = vpack.c.bf16 %v4078_v3, %v4075_v2  ;;  %v4088_v6 = vld [vmem:[%s4072_s9 + $0x18] sm:$0xff]  ;;  %v4095_v8 = vld [vmem:[%s4072_s9 + $0x20] sm:$0xff]  ;;  %v4098_v9 = vld [vmem:[%s4072_s9 + $0x28] sm:$0xff]  ;;  %1408 = vrot.lane.b32.xlu0 %v4075_v2, %s3978_s6  ;;  %s3920_s20 = scalar_lea.vmem %s3919_s14, 32 }
  0x1d   : > { %v4092_v7 = vpack.c.bf16 %v4088_v6, %v4081_v4  ;;  %v4107_v10 = vpack.c.bf16 %v4098_v9, %v4095_v8  ;;  %v4111_v11 = vld [vmem:[%s4072_s9 + $0x30] sm:$0xff]  ;;  %v4114_v12 = vld [vmem:[%s4072_s9 + $0x38] sm:$0xff]  ;;  %v4125_v14 = vld [vmem:[%s4072_s9 + $0x40] sm:$0xff]  ;;  %1412 = vrot.lane.b32.xlu1 %v4081_v4, %s3978_s6 }
  0x1e   : > { %3397 = vmatprep.subr.bf16.mxu1 %v4085_v5  ;;  %3365 = vmatprep.subr.bf16.mxu0 %v4085_v5  ;;  %v4121_v13 = vpack.c.bf16 %v4114_v12, %v4111_v11  ;;  %v4128_v15 = vld [vmem:[%s4072_s9 + $0x48] sm:$0xff]  ;;  %v4139_v17 = vld [vmem:[%s4072_s9 + $0x50] sm:$0xff]  ;;  %v4142_v18 = vld [vmem:[%s4072_s9 + $0x58] sm:$0xff] }
  0x1f   : > { %3399 = vmatpush3.bf16.msra.mxu1 %v4085_v5  ;;  %3367 = vmatpush3.bf16.msra.mxu0 %v4085_v5  ;;  %v4135_v16 = vpack.c.bf16 %v4128_v15, %v4125_v14  ;;  %v4149_v19 = vpack.c.bf16 %v4142_v18, %v4139_v17  ;;  %v4153_v20 = vld [vmem:[%s4072_s9 + $0x60] sm:$0xff]  ;;  %v4156_v21 = vld [vmem:[%s4072_s9 + $0x68] sm:$0xff]  ;;  %v4167_v23 = vld [vmem:[%s4072_s9 + $0x70] sm:$0xff] }
  0x20   : > { %3401 = vmatprep.subr.bf16.mxu1 %v4092_v7  ;;  %3369 = vmatprep.subr.bf16.mxu0 %v4092_v7  ;;  %v4163_v22 = vpack.c.bf16 %v4156_v21, %v4153_v20  ;;  %v4170_v24 = vld [vmem:[%s4072_s9 + $0x78] sm:$0xff]  ;;  %v2378_v48 = vld [vmem:[%s5157_s3 + $0xd0] sm:$0xff]  ;;  %v2380_v51 = vld [vmem:[%s5157_s3 + $0xe0] sm:$0xff] }
  0x21   : > { %v4177_v25 = vpack.c.bf16 %v4170_v24, %v4167_v23  ;;  %v2375_v43 = vld [vmem:[%s5157_s3 + $0xb8] sm:$0xff]  ;;  %v2381_v52 = vld [vmem:[%s5157_s3 + $0xe8] sm:$0xff]  ;;  %v2382_v54 = vld [vmem:[%s5157_s3 + $0xf0] sm:$0xff]  ;;  %1410 = vrot.lane.b32.xlu0 %v4078_v3, %s3978_s6 }
  0x22   : > { %v3440_v44 = vpack.c.bf16 %v2375_v43, %v2374_v42  ;;  %v2379_v49 = vld [vmem:[%s5157_s3 + $0xd8] sm:$0xff]  ;;  %v3452_v53 = vpack.c.bf16 %v2381_v52, %v2380_v51  ;;  %v2385_v57 = vld [vmem:[%s5156_s2 + $0x48] sm:$0xff]  ;;  %v2386_v58 = vld [vmem:[%s5156_s2 + $0x50] sm:$0xff]  ;;  %1414 = vrot.lane.b32.xlu1 %v4088_v6, %s3978_s6 }
  0x23   : > { %3403 = vmatpush3.bf16.msra.mxu1 %v4092_v7  ;;  %3371 = vmatpush3.bf16.msra.mxu0 %v4092_v7  ;;  %v3448_v50 = vpack.c.bf16 %v2379_v49, %v2378_v48  ;;  %v2383_v55 = vld [vmem:[%s5157_s3 + $0xf8] sm:$0xff]  ;;  %v2404_v60 = vld [vmem:[%s5156_s2 + $0x60] sm:$0xff]  ;;  %v2405_v61 = vld [vmem:[%s5156_s2 + $0x68] sm:$0xff] }
  0x24   : > { %3405 = vmatprep.subr.bf16.mxu1 %v4107_v10  ;;  %3373 = vmatprep.subr.bf16.mxu0 %v4107_v10  ;;  %v3456_v56 = vpack.c.bf16 %v2383_v55, %v2382_v54  ;;  %v2387_v59 = vld [vmem:[%s5156_s2 + $0x58] sm:$0xff]  ;;  %v2406_v62 = vld [vmem:[%s5156_s2 + $0x70] sm:$0xff]  ;;  %v2424_v0 = vld [vmem:[%s5156_s2 + $0x80] sm:$0xff] }
  0x25   : > { %v2407_v63 = vld [vmem:[%s5156_s2 + $0x78] sm:$0xff]  ;;  %v324_v1 = vld [vmem:[%s5157_s3] sm:$0xff]  ;;  %1416 = vrot.lane.b32.xlu0 %v4095_v8, %s3978_s6  ;;  %v330_v37 = vld [vmem:[%s5157_s3 + $0x30] sm:$0xff] }
  0x26   : > { %1418 = vrot.lane.b32.xlu1 %v4098_v9, %s3978_s6  ;;  %v331_v38 = vld [vmem:[%s5157_s3 + $0x38] sm:$0xff]  ;;  %v334_v43 = vld [vmem:[%s5157_s3 + $0x50] sm:$0xff]  ;;  %v336_v46 = vld [vmem:[%s5157_s3 + $0x60] sm:$0xff] }
  0x27   : > { %3407 = vmatpush3.bf16.msra.mxu1 %v4107_v10  ;;  %3375 = vmatpush3.bf16.msra.mxu0 %v4107_v10  ;;  %v338_v49 = vld [vmem:[%s5157_s3 + $0x70] sm:$0xff]  ;;  %v2388_v52 = vld [vmem:[%s5157_s3 + $0x100] sm:$0xff]  ;;  %vm4939_vm4 = vmpackc.low %vm1746_vm1, %vm3983_vm3 }
  0x28   : > { %3409 = vmatprep.subr.bf16.mxu1 %v4121_v13  ;;  %3377 = vmatprep.subr.bf16.mxu0 %v4121_v13  ;;  %v2390_v55 = vld [vmem:[%s5157_s3 + $0x110] sm:$0xff]  ;;  %vm3835_vm8 = vmpackc.low %vm2169_vm7, %vm3983_vm3 }
  0x29   : > { %1420 = vrot.lane.b32.xlu0 %v4111_v11, %s3978_s6 }
  0x2a   : > { %1422 = vrot.lane.b32.xlu1 %v4114_v12, %s3978_s6 }
  0x2b   : > { %3411 = vmatpush3.bf16.msra.mxu1 %v4121_v13  ;;  %3379 = vmatpush3.bf16.msra.mxu0 %v4121_v13 }
  0x2c   : > { %3413 = vmatprep.subr.bf16.mxu1 %v4135_v16  ;;  %3381 = vmatprep.subr.bf16.mxu0 %v4135_v16 }
  0x2d   : > { %1424 = vrot.lane.b32.xlu0 %v4125_v14, %s3978_s6 }
  0x2e   : > { %1426 = vrot.lane.b32.xlu1 %v4128_v15, %s3978_s6 }
  0x2f   : > { %3415 = vmatpush3.bf16.msra.mxu1 %v4135_v16  ;;  %3383 = vmatpush3.bf16.msra.mxu0 %v4135_v16 }
  0x30   : > { %3417 = vmatprep.subr.bf16.mxu1 %v4149_v19  ;;  %3385 = vmatprep.subr.bf16.mxu0 %v4149_v19 }
  0x31   : > { %1428 = vrot.lane.b32.xlu0 %v4139_v17, %s3978_s6 }
  0x32   : > { %1430 = vrot.lane.b32.xlu1 %v4142_v18, %s3978_s6 }
  0x33   : > { %3419 = vmatpush3.bf16.msra.mxu1 %v4149_v19  ;;  %3387 = vmatpush3.bf16.msra.mxu0 %v4149_v19 }
  0x34   : > { %3421 = vmatprep.subr.bf16.mxu1 %v4163_v22  ;;  %3389 = vmatprep.subr.bf16.mxu0 %v4163_v22 }
  0x35   : > { %1432 = vrot.lane.b32.xlu0 %v4153_v20, %s3978_s6 }
  0x36   : > { %1434 = vrot.lane.b32.xlu1 %v4156_v21, %s3978_s6 }
  0x37   : > { %3423 = vmatpush3.bf16.msra.mxu1 %v4163_v22  ;;  %3391 = vmatpush3.bf16.msra.mxu0 %v4163_v22 }
  0x38   : > { %3425 = vmatprep.subr.bf16.mxu1 %v4177_v25  ;;  %3393 = vmatprep.subr.bf16.mxu0 %v4177_v25 }
  0x39   : > { %1436 = vrot.lane.b32.xlu0 %v4167_v23, %s3978_s6 }
  0x3a   : > { %1438 = vrot.lane.b32.xlu1 %v4170_v24, %s3978_s6 }
  0x3b   : > { %3427 = vmatpush3.bf16.msra.mxu1 %v4177_v25  ;;  %3395 = vmatpush3.bf16.msra.mxu0 %v4177_v25 }
  0x3c   : > { %3493 = vmatprep.subr.bf16.mxu1 %v4085_v5  ;;  %3429 = vmatprep.subr.bf16.mxu0 %v3428_v28 }
  0x3e   : > { %2834 = vmatmul.mubr.f32.vlgmr.msra.gmra.mrb[0].mxu1 %v2365_v29  ;;  %2796 = vmatmul.mubr.f32.vlgmr.msra.gmra.mrb[0].mxu0 %v236_v30  ;;  %v328_v30 = vld [vmem:[%s5157_s3 + $0x20] sm:$0xff] }
  0x3f   : > { %2836 = vmatprep.mubr.f32.mxu1 %v2366_v31  ;;  %3495 = vmatpush3.bf16.msra.mxu1 %v4085_v5  ;;  %v329_v31 = vld [vmem:[%s5157_s3 + $0x28] sm:$0xff] }
  0x40   : > { %3497 = vmatprep.subr.bf16.mxu1 %v4092_v7  ;;  %2798 = vmatprep.mubr.f32.mxu0 %v237_v32  ;;  %v3468_v34 = vpack.c.bf16 %v329_v31, %v328_v30  ;;  %v2403_v30 = vld [vmem:[%s5157_s3 + $0x178] sm:$0xff] }
  0x41   : > { %3431 = vmatpush3.bf16.msra.mxu0 %v3428_v28 }
  0x42   : > { %2837 = vmatmul.mubr.f32.gmra.mrb[2].mxu1 %v2367_v35  ;;  %2799 = vmatmul.mubr.f32.gmra.mrb[2].mxu0 %v238_v36 }
  0x43   : > { %3499 = vmatpush3.bf16.msra.mxu1 %v4092_v7  ;;  %2947 = vmatprep.mubr.f32.mxu1 %v2384_v39  ;;  %v3472_v39 = vpack.c.bf16 %v331_v38, %v330_v37  ;;  %v5163_v38 = vmov 0.0|0.0  }
  0x44   : > { %3501 = vmatprep.subr.bf16.mxu1 %v4107_v10  ;;  %3433 = vmatprep.subr.bf16.mxu0 %v3432_v40 }
  0x45   : > { %3435 = vmatpush3.bf16.msra.mxu0 %v3432_v40  ;;  %v332_v40 = vld [vmem:[%s5157_s3 + $0x40] sm:$0xff] }
  0x46   : > { %3437 = vmatprep.subr.bf16.mxu0 %v3436_v41 }
  0x47   : > { %3503 = vmatpush3.bf16.msra.mxu1 %v4107_v10 }
  0x48   : > { %3505 = vmatprep.subr.bf16.mxu1 %v4121_v13 }
  0x49   : > { %3439 = vmatpush3.bf16.msra.mxu0 %v3436_v41  ;;  %v333_v41 = vld [vmem:[%s5157_s3 + $0x48] sm:$0xff] }
  0x4a   : > { %3441 = vmatprep.subr.bf16.mxu0 %v3440_v44  ;;  %v3476_v42 = vpack.c.bf16 %v333_v41, %v332_v40 }
  0x4b   : > { %3507 = vmatpush3.bf16.msra.mxu1 %v4121_v13 }
  0x4c   : > { %3509 = vmatprep.subr.bf16.mxu1 %v4135_v16 }
  0x4d   : > { %3443 = vmatpush3.bf16.msra.mxu0 %v3440_v44  ;;  %v335_v44 = vld [vmem:[%s5157_s3 + $0x58] sm:$0xff] }
  0x4e   : > { %3445 = vmatprep.subr.bf16.mxu0 %v3444_v47  ;;  %v3480_v45 = vpack.c.bf16 %v335_v44, %v334_v43 }
  0x4f   : > { %3511 = vmatpush3.bf16.msra.mxu1 %v4135_v16 }
  0x50   : > { %3513 = vmatprep.subr.bf16.mxu1 %v4149_v19 }
  0x51   : > { %3447 = vmatpush3.bf16.msra.mxu0 %v3444_v47  ;;  %v337_v47 = vld [vmem:[%s5157_s3 + $0x68] sm:$0xff] }
  0x52   : > { %3449 = vmatprep.subr.bf16.mxu0 %v3448_v50  ;;  %v3484_v48 = vpack.c.bf16 %v337_v47, %v336_v46 }
  0x53   : > { %3515 = vmatpush3.bf16.msra.mxu1 %v4149_v19 }
  0x54   : > { %3517 = vmatprep.subr.bf16.mxu1 %v4163_v22 }
  0x55   : > { %3451 = vmatpush3.bf16.msra.mxu0 %v3448_v50  ;;  %v339_v50 = vld [vmem:[%s5157_s3 + $0x78] sm:$0xff] }
  0x56   : > { %3453 = vmatprep.subr.bf16.mxu0 %v3452_v53  ;;  %v3488_v51 = vpack.c.bf16 %v339_v50, %v338_v49  ;;  %v2412_v49 = vld [vmem:[%s5157_s3 + $0x1a0] sm:$0xff] }
  0x57   : > { %3519 = vmatpush3.bf16.msra.mxu1 %v4163_v22 }
  0x58   : > { %3521 = vmatprep.subr.bf16.mxu1 %v4177_v25 }
  0x59   : > { %3455 = vmatpush3.bf16.msra.mxu0 %v3452_v53  ;;  %v2389_v53 = vld [vmem:[%s5157_s3 + $0x108] sm:$0xff] }
  0x5a   : > { %3457 = vmatprep.subr.bf16.mxu0 %v3456_v56  ;;  %v3524_v54 = vpack.c.bf16 %v2389_v53, %v2388_v52 }
  0x5b   : > { %3523 = vmatpush3.bf16.msra.mxu1 %v4177_v25 }
  0x5c   : > { %3557 = vmatprep.subr.bf16.mxu1 %v4085_v5 }
  0x5d   : > { %3459 = vmatpush3.bf16.msra.mxu0 %v3456_v56  ;;  %v2391_v56 = vld [vmem:[%s5157_s3 + $0x118] sm:$0xff] }
  0x5e   : > { %2948 = vmatmul.mubr.f32.vlgmr.msra.gmra.mrb[4].mxu1 %v2385_v57 }
  0x5f   : > { %3559 = vmatpush3.bf16.msra.mxu1 %v4085_v5  ;;  %2950 = vmatprep.mubr.f32.mxu1 %v2386_v58  ;;  %v3528_v58 = vpack.c.bf16 %v2391_v56, %v2390_v55  ;;  %v2415_v56 = vld [vmem:[%s5157_s3 + $0x1b8] sm:$0xff] }
  0x60   : > { %3561 = vmatprep.subr.bf16.mxu1 %v4092_v7 }
  0x62   : > { %2951 = vmatmul.mubr.f32.gmra.mrb[6].mxu1 %v2387_v59 }
  0x63   : > { %3563 = vmatpush3.bf16.msra.mxu1 %v4092_v7  ;;  %3023 = vmatprep.mubr.f32.mxu1 %v2404_v60  ;;  %v2392_v60 = vld [vmem:[%s5157_s3 + $0x120] sm:$0xff] }
  0x64   : > { %3565 = vmatprep.subr.bf16.mxu1 %v4107_v10 }
  0x67   : > { %3567 = vmatpush3.bf16.msra.mxu1 %v4107_v10 }
  0x68   : > { %3569 = vmatprep.subr.bf16.mxu1 %v4121_v13 }
  0x6b   : > { %3571 = vmatpush3.bf16.msra.mxu1 %v4121_v13 }
  0x6c   : > { %3573 = vmatprep.subr.bf16.mxu1 %v4135_v16 }
  0x6f   : > { %3575 = vmatpush3.bf16.msra.mxu1 %v4135_v16 }
  0x70   : > { %3577 = vmatprep.subr.bf16.mxu1 %v4149_v19 }
  0x73   : > { %3579 = vmatpush3.bf16.msra.mxu1 %v4149_v19 }
  0x74   : > { %3581 = vmatprep.subr.bf16.mxu1 %v4163_v22 }
  0x77   : > { %3583 = vmatpush3.bf16.msra.mxu1 %v4163_v22 }
  0x78   : > { %3585 = vmatprep.subr.bf16.mxu1 %v4177_v25 }
  0x7b   : > { %3587 = vmatpush3.bf16.msra.mxu1 %v4177_v25 }
  0x7c   : > { %3621 = vmatprep.subr.bf16.mxu1 %v4085_v5 }
  0x7e   : > { %3024 = vmatmul.mubr.f32.vlgmr.msra.gmra.mrb[8].mxu1 %v2405_v61  ;;  %v2393_v61 = vld [vmem:[%s5157_s3 + $0x128] sm:$0xff] }
  0x7f   : > { %3623 = vmatpush3.bf16.msra.mxu1 %v4085_v5  ;;  %3026 = vmatprep.mubr.f32.mxu1 %v2406_v62  ;;  %v325_v5 = vld [vmem:[%s5157_s3 + $0x8] sm:$0xff] }
  0x80   : > { %3625 = vmatprep.subr.bf16.mxu1 %v4092_v7 }
  0x82   : > { %3027 = vmatmul.mubr.f32.gmra.mrb[10].mxu1 %v2407_v63  ;;  %v3532_v63 = vpack.c.bf16 %v2393_v61, %v2392_v60  ;;  %v2416_v61 = vld [vmem:[%s5157_s3 + $0x1c0] sm:$0xff] }
  0x83   : > { %3627 = vmatpush3.bf16.msra.mxu1 %v4092_v7  ;;  %3099 = vmatprep.mubr.f32.mxu1 %v2424_v0  ;;  %v3460_v7 = vpack.c.bf16 %v325_v5, %v324_v1  ;;  %v2394_v1 = vld [vmem:[%s5157_s3 + $0x130] sm:$0xff]  ;;  %v2395_v5 = vld [vmem:[%s5157_s3 + $0x138] sm:$0xff] }
  0x84   : > { %3629 = vmatprep.subr.bf16.mxu1 %v4107_v10 }
  0x85   : > { %3461 = vmatprep.subr.bf16.mxu0 %v3460_v7 }
  0x87   : > { %3631 = vmatpush3.bf16.msra.mxu1 %v4107_v10  ;;  %v2425_v10 = vld [vmem:[%s5156_s2 + $0x88] sm:$0xff] }
  0x88   : > { %3633 = vmatprep.subr.bf16.mxu1 %v4121_v13 }
  0x8b   : > { %3635 = vmatpush3.bf16.msra.mxu1 %v4121_v13  ;;  %v2426_v13 = vld [vmem:[%s5156_s2 + $0x90] sm:$0xff] }
  0x8c   : > { %3637 = vmatprep.subr.bf16.mxu1 %v4135_v16 }
  0x8e   : > { %v1409_v31 = vpop.permute.xlu0 %1408 }
  0x8f   : > { %3639 = vmatpush3.bf16.msra.mxu1 %v4135_v16  ;;  %v2427_v16 = vld [vmem:[%s5156_s2 + $0x98] sm:$0xff] }
  0x90   : > { %3641 = vmatprep.subr.bf16.mxu1 %v4149_v19 }
  0x93   : > { %3643 = vmatpush3.bf16.msra.mxu1 %v4149_v19  ;;  %v326_v19 = vld [vmem:[%s5157_s3 + $0x10] sm:$0xff] }
  0x94   : > { %3645 = vmatprep.subr.bf16.mxu1 %v4163_v22 }
  0x97   : > { %3647 = vmatpush3.bf16.msra.mxu1 %v4163_v22  ;;  %v327_v22 = vld [vmem:[%s5157_s3 + $0x18] sm:$0xff] }
  0x98   : > { %3649 = vmatprep.subr.bf16.mxu1 %v4177_v25  ;;  %v3464_v28 = vpack.c.bf16 %v327_v22, %v326_v19  ;;  %v2398_v19 = vld [vmem:[%s5157_s3 + $0x150] sm:$0xff]  ;;  %v2399_v22 = vld [vmem:[%s5157_s3 + $0x158] sm:$0xff] }
  0x9b   : > { %3651 = vmatpush3.bf16.msra.mxu1 %v4177_v25 }
  0x9c   : > { %3684 = vmatprep.subr.bf16.mxu1 %v5163_v38 }
  0x9e   : > { %3100 = vmatmul.mubr.f32.vlgmr.msra.gmra.mrb[12].mxu1 %v2425_v10  ;;  %v2396_v10 = vld [vmem:[%s5157_s3 + $0x140] sm:$0xff] }
  0x9f   : > { %3102 = vmatprep.mubr.f32.mxu1 %v2426_v13  ;;  %v2397_v13 = vld [vmem:[%s5157_s3 + $0x148] sm:$0xff] }
  0xa2   : > { %3103 = vmatmul.mubr.f32.gmra.mrb[14].mxu1 %v2427_v16  ;;  %v3540_v16 = vpack.c.bf16 %v2397_v13, %v2396_v10 }
 0x111   : > { %v2835_v25 = vpop.f32.mrb[0].mxu1  ;;  %v2797_v26 = vpop.f32.mrb[0].mxu0 }
 0x112   : > { %v411_v27 = vpop.f32.mrb[1].mxu1  ;;  %v305_v29 = vpop.f32.mrb[1].mxu0 }
 0x113   : > { %2871 = vmatprep.mubr.f32.mxu0 %v411_v27  ;;  %v2401_v27 = vld [vmem:[%s5157_s3 + $0x168] sm:$0xff] }
 0x114   : > { %2872 = vmatmul.mubr.f32.vlgmr.msra.gmra.mrb[4].mxu0 %v2835_v25  ;;  %v3544_v25 = vpack.c.bf16 %v2399_v22, %v2398_v19  ;;  %v2420_v19 = vld [vmem:[%s5157_s3 + $0x1e0] sm:$0xff] }
 0x115   : > { %3463 = vmatpush3.bf16.msra.mxu0 %v3460_v7  ;;  %v2838_v32 = vpop.f32.mrb[2].mxu1  ;;  %v2800_v33 = vpop.f32.mrb[2].mxu0  ;;  %v3536_v7 = vpack.c.bf16 %v2395_v5, %v2394_v1  ;;  %v2418_v5 = vld [vmem:[%s5157_s3 + $0x1d0] sm:$0xff] }
 0x116   : > { %3465 = vmatprep.subr.bf16.mxu0 %v3464_v28  ;;  %v421_v35 = vpop.f32.mrb[3].mxu1  ;;  %v315_v36 = vpop.f32.mrb[3].mxu0 }
 0x117   : > { %2874 = vmatprep.mubr.f32.mxu0 %v421_v35  ;;  %v2408_v35 = vld [vmem:[%s5157_s3 + $0x180] sm:$0xff] }
 0x118   : > { %2875 = vmatmul.mubr.f32.gmra.mrb[6].mxu0 %v2838_v32  ;;  %v1413_v32 = vpop.permute.xlu1 %1412 }
 0x119   : > { %3467 = vmatpush3.bf16.msra.mxu0 %v3464_v28  ;;  %2909 = vmatprep.mubr.f32.mxu0 %v305_v29  ;;  %v2402_v29 = vld [vmem:[%s5157_s3 + $0x170] sm:$0xff]  ;;  %v4480_v37 = vsub.f32 %v4081_v4, %v1413_v32  ;;  %v2411_v4 = vld [vmem:[%s5157_s3 + $0x198] sm:$0xff] }
 0x11a   : > { %3469 = vmatprep.subr.bf16.mxu0 %v3468_v34  ;;  %v2430_v32 = vld [vmem:[%s5157_s3 + $0x210] sm:$0xff] }
 0x11d   : > { %3471 = vmatpush3.bf16.msra.mxu0 %v3468_v34  ;;  %v3552_v34 = vpack.c.bf16 %v2403_v30, %v2402_v29  ;;  %v2428_v30 = vld [vmem:[%s5157_s3 + $0x200] sm:$0xff] }
 0x11e   : > { %3473 = vmatprep.subr.bf16.mxu0 %v3472_v39 }
 0x121   : > { %3475 = vmatpush3.bf16.msra.mxu0 %v3472_v39  ;;  %v1415_v39 = vpop.permute.xlu1 %1414 }
 0x122   : > { %3477 = vmatprep.subr.bf16.mxu0 %v3476_v42  ;;  %v4497_v43 = vsub.f32 %v4088_v6, %v1415_v39  ;;  %v2413_v6 = vld [vmem:[%s5157_s3 + $0x1a8] sm:$0xff]  ;;  %v2432_v39 = vld [vmem:[%s5157_s3 + $0x220] sm:$0xff] }
 0x125   : > { %3479 = vmatpush3.bf16.msra.mxu0 %v3476_v42  ;;  %v2410_v42 = vld [vmem:[%s5157_s3 + $0x190] sm:$0xff] }
 0x126   : > { %3481 = vmatprep.subr.bf16.mxu0 %v3480_v45  ;;  %v3592_v47 = vpack.c.bf16 %v2411_v4, %v2410_v42 }
 0x129   : > { %3483 = vmatpush3.bf16.msra.mxu0 %v3480_v45 }
 0x12a   : > { %3485 = vmatprep.subr.bf16.mxu0 %v3484_v48 }
 0x12d   : > { %3487 = vmatpush3.bf16.msra.mxu0 %v3484_v48 }
 0x12e   : > { %3489 = vmatprep.subr.bf16.mxu0 %v3488_v51 }
 0x131   : > { %3491 = vmatpush3.bf16.msra.mxu0 %v3488_v51  ;;  %v4428_v57 = vpop.f32.mrb[4].mxu1 }
 0x132   : > { %3525 = vmatprep.subr.bf16.mxu0 %v3524_v54  ;;  %v688_v59 = vpop.f32.mrb[5].mxu1 }
 0x134   : > { %2910 = vmatmul.mubr.f32.vlgmr.msra.gmra.mrb[4].mxu0 %v2797_v26  ;;  %v2400_v26 = vld [vmem:[%s5157_s3 + $0x160] sm:$0xff] }
 0x135   : > { %3527 = vmatpush3.bf16.msra.mxu0 %v3524_v54  ;;  %2912 = vmatprep.mubr.f32.mxu0 %v315_v36  ;;  %v4436_v62 = vpop.f32.mrb[6].mxu1  ;;  %v3548_v28 = vpack.c.bf16 %v2401_v27, %v2400_v26  ;;  %v2409_v36 = vld [vmem:[%s5157_s3 + $0x188] sm:$0xff]  ;;  %v3596_v54 = vpack.c.bf16 %v2413_v6, %v2412_v49 }
 0x136   : > { %3529 = vmatprep.subr.bf16.mxu0 %v3528_v58  ;;  %v4438_v0 = vpop.f32.mrb[7].mxu1  ;;  %v3588_v41 = vpack.c.bf16 %v2409_v36, %v2408_v35  ;;  %v2437_v49 = vld [vmem:[%s5157_s3 + $0x248] sm:$0xff] }
 0x138   : > { %2913 = vmatmul.mubr.f32.gmra.mrb[6].mxu0 %v2800_v33  ;;  %v4471_v33 = vsub.f32 %v4075_v2, %v1409_v31  ;;  %v1411_v2 = vpop.permute.xlu0 %1410  ;;  %v2429_v31 = vld [vmem:[%s5157_s3 + $0x208] sm:$0xff] }
 0x139   : > { %3531 = vmatpush3.bf16.msra.mxu0 %v3528_v58  ;;  %2985 = vmatprep.mubr.f32.mxu0 %v688_v59  ;;  %v4486_v40 = vsub.f32 %v4078_v3, %v1411_v2  ;;  %v1419_v3 = vpop.permute.xlu1 %1418 }
 0x13a   : > { %3533 = vmatprep.subr.bf16.mxu0 %v3532_v63  ;;  %1585 = vrot.lane.b32.xlu0 %v4471_v33, %s3978_s6  ;;  %v4515_v50 = vsub.f32 %v4098_v9, %v1419_v3  ;;  %v2414_v9 = vld [vmem:[%s5157_s3 + $0x1b0] sm:$0xff] }
 0x13b   : > { %1587 = vrot.lane.b32.xlu1 %v4486_v40, %s3978_s6  ;;  %v3600_v60 = vpack.c.bf16 %v2415_v56, %v2414_v9  ;;  %v2442_v56 = vld [vmem:[%s5157_s3 + $0x270] sm:$0xff] }
 0x13c   : > { %v1417_v44 = vpop.permute.xlu0 %1416 }
 0x13d   : > { %3535 = vmatpush3.bf16.msra.mxu0 %v3532_v63  ;;  %v4504_v46 = vsub.f32 %v4095_v8, %v1417_v44  ;;  %v1423_v8 = vpop.permute.xlu1 %1422  ;;  %v2434_v44 = vld [vmem:[%s5157_s3 + $0x230] sm:$0xff] }
 0x13e   : > { %3537 = vmatprep.subr.bf16.mxu0 %v3536_v7  ;;  %1589 = vrot.lane.b32.xlu0 %v4480_v37, %s3978_s6 }
 0x13f   : > { %1591 = vrot.lane.b32.xlu1 %v4497_v43, %s3978_s6 }
 0x140   : > { %v1421_v51 = vpop.permute.xlu0 %1420 }
 0x141   : > { %3539 = vmatpush3.bf16.msra.mxu0 %v3536_v7  ;;  %v4524_v53 = vsub.f32 %v4111_v11, %v1421_v51  ;;  %v1427_v11 = vpop.permute.xlu1 %1426  ;;  %v2439_v51 = vld [vmem:[%s5157_s3 + $0x258] sm:$0xff] }
 0x142   : > { %3541 = vmatprep.subr.bf16.mxu0 %v3540_v16  ;;  %1593 = vrot.lane.b32.xlu0 %v4504_v46, %s3978_s6 }
 0x143   : > { %1595 = vrot.lane.b32.xlu1 %v4515_v50, %s3978_s6 }
 0x144   : > { %v1425_v58 = vpop.permute.xlu0 %1424 }
 0x145   : > { %3543 = vmatpush3.bf16.msra.mxu0 %v3540_v16  ;;  %v4543_v59 = vsub.f32 %v4125_v14, %v1425_v58  ;;  %v1431_v14 = vpop.permute.xlu1 %1430 }
 0x146   : > { %3545 = vmatprep.subr.bf16.mxu0 %v3544_v25  ;;  %1597 = vrot.lane.b32.xlu0 %v4524_v53, %s3978_s6  ;;  %v4570_v7 = vsub.f32 %v4142_v18, %v1431_v14  ;;  %v2421_v18 = vld [vmem:[%s5157_s3 + $0x1e8] sm:$0xff] }
 0x147   : > { %v3612_v27 = vpack.c.bf16 %v2421_v18, %v2420_v19 }
 0x148   : > { %v1429_v63 = vpop.permute.xlu0 %1428 }
 0x149   : > { %3547 = vmatpush3.bf16.msra.mxu0 %v3544_v25 }
 0x14a   : > { %3549 = vmatprep.subr.bf16.mxu0 %v3548_v28  ;;  %1601 = vrot.lane.b32.xlu0 %v4543_v59, %s3978_s6 }
 0x14c   : > { %v1433_v10 = vpop.permute.xlu0 %1432 }
 0x14d   : > { %3551 = vmatpush3.bf16.msra.mxu0 %v3548_v28  ;;  %v4575_v13 = vsub.f32 %v4153_v20, %v1433_v10  ;;  %v2422_v28 = vld [vmem:[%s5157_s3 + $0x1f0] sm:$0xff] }
 0x14e   : > { %3553 = vmatprep.subr.bf16.mxu0 %v3552_v34 }
 0x150   : > { %v1437_v25 = vpop.permute.xlu0 %1436 }
 0x151   : > { %3555 = vmatpush3.bf16.msra.mxu0 %v3552_v34  ;;  %v4501_v45 = vpop.f32.mrb[8].mxu1  ;;  %v4591_v26 = vsub.f32 %v4167_v23, %v1437_v25  ;;  %v2431_v34 = vld [vmem:[%s5157_s3 + $0x218] sm:$0xff] }
 0x152   : > { %3589 = vmatprep.subr.bf16.mxu0 %v3588_v41  ;;  %v884_v48 = vpop.f32.mrb[9].mxu1  ;;  %v3656_v36 = vpack.c.bf16 %v2431_v34, %v2430_v32 }
 0x154   : > { %2986 = vmatmul.mubr.f32.vlgmr.msra.gmra.mrb[4].mxu0 %v4428_v57  ;;  %v4537_v57 = vsub.f32 %v4114_v12, %v1423_v8  ;;  %v2417_v12 = vld [vmem:[%s5157_s3 + $0x1c8] sm:$0xff]  ;;  %v2438_v8 = vld [vmem:[%s5157_s3 + $0x250] sm:$0xff] }
 0x155   : > { %3591 = vmatpush3.bf16.msra.mxu0 %v3588_v41  ;;  %2988 = vmatprep.mubr.f32.mxu0 %v4438_v0  ;;  %v4521_v52 = vpop.f32.mrb[10].mxu1  ;;  %v4559_v0 = vsub.f32 %v4139_v17, %v1429_v63  ;;  %v3604_v1 = vpack.c.bf16 %v2417_v12, %v2416_v61  ;;  %v1435_v17 = vpop.permute.xlu1 %1434  ;;  %v2433_v41 = vld [vmem:[%s5157_s3 + $0x228] sm:$0xff] }
 0x156   : > { %3593 = vmatprep.subr.bf16.mxu0 %v3592_v47  ;;  %v4526_v55 = vpop.f32.mrb[11].mxu1  ;;  %1599 = vrot.lane.b32.xlu1 %v4537_v57, %s3978_s6  ;;  %v4586_v22 = vsub.f32 %v4156_v21, %v1435_v17  ;;  %v2423_v21 = vld [vmem:[%s5157_s3 + $0x1f8] sm:$0xff]  ;;  %v3660_v4 = vpack.c.bf16 %v2433_v41, %v2432_v39 }
 0x157   : > { %1605 = vrot.lane.b32.xlu0 %v4559_v0, %s3978_s6  ;;  %v3616_v23 = vpack.c.bf16 %v2423_v21, %v2422_v28 }
 0x158   : > { %2989 = vmatmul.mubr.f32.gmra.mrb[6].mxu0 %v4436_v62  ;;  %v4554_v62 = vsub.f32 %v4128_v15, %v1427_v11  ;;  %v2419_v15 = vld [vmem:[%s5157_s3 + $0x1d8] sm:$0xff] }
 0x159   : > { %3595 = vmatpush3.bf16.msra.mxu0 %v3592_v47  ;;  %3061 = vmatprep.mubr.f32.mxu0 %v884_v48  ;;  %v3608_v16 = vpack.c.bf16 %v2419_v15, %v2418_v5  ;;  %v1439_v20 = vpop.permute.xlu1 %1438  ;;  %v2435_v47 = vld [vmem:[%s5157_s3 + $0x238] sm:$0xff]  ;;  %v2436_v48 = vld [vmem:[%s5157_s3 + $0x240] sm:$0xff] }
 0x15a   : > { %3597 = vmatprep.subr.bf16.mxu0 %v3596_v54  ;;  %1603 = vrot.lane.b32.xlu1 %v4554_v62, %s3978_s6  ;;  %v4602_v29 = vsub.f32 %v4170_v24, %v1439_v20  ;;  %v3652_v24 = vpack.c.bf16 %v2429_v31, %v2428_v30  ;;  %v3668_v6 = vpack.c.bf16 %v2437_v49, %v2436_v48  ;;  %v2443_v11 = vld [vmem:[%s5157_s3 + $0x278] sm:$0xff] }
 0x15b   : > { %1609 = vrot.lane.b32.xlu0 %v4575_v13, %s3978_s6  ;;  %v3680_v58 = vpack.c.bf16 %v2443_v11, %v2442_v56 }
 0x15c   : > { %5177 = vst [vmem:[#allocation5_spill] sm:$0xff] %v4602_v29 }
 0x15d   : > { %3599 = vmatpush3.bf16.msra.mxu0 %v3596_v54  ;;  %v2440_v54 = vld [vmem:[%s5157_s3 + $0x260] sm:$0xff] }
 0x15e   : > { %3601 = vmatprep.subr.bf16.mxu0 %v3600_v60  ;;  %1607 = vrot.lane.b32.xlu1 %v4570_v7, %s3978_s6 }
 0x15f   : > { %1613 = vrot.lane.b32.xlu0 %v4591_v26, %s3978_s6 }
 0x161   : > { %3603 = vmatpush3.bf16.msra.mxu0 %v3600_v60 }
 0x162   : > { %3605 = vmatprep.subr.bf16.mxu0 %v3604_v1  ;;  %1611 = vrot.lane.b32.xlu1 %v4586_v22, %s3978_s6 }
 0x165   : > { %3607 = vmatpush3.bf16.msra.mxu0 %v3604_v1 }
 0x166   : > { %3609 = vmatprep.subr.bf16.mxu0 %v3608_v16  ;;  %1615 = vrot.lane.b32.xlu1 %v4602_v29, %s3978_s6  ;;  %s5112_s6 = scalar_lea.hbm %s5158_s4, %s2451_s30 }
 0x169   : > { %3611 = vmatpush3.bf16.msra.mxu0 %v3608_v16 }
 0x16a   : > { %3613 = vmatprep.subr.bf16.mxu0 %v3612_v27 }
 0x16d   : > { %3615 = vmatpush3.bf16.msra.mxu0 %v3612_v27 }
 0x16e   : > { %3617 = vmatprep.subr.bf16.mxu0 %v3616_v23 }
 0x171   : > { %3619 = vmatpush3.bf16.msra.mxu0 %v3616_v23  ;;  %v3101_v35 = vpop.f32.mrb[12].mxu1 }
 0x172   : > { %3653 = vmatprep.subr.bf16.mxu0 %v3652_v24  ;;  %v1080_v2 = vpop.f32.mrb[13].mxu1 }
 0x174   : > { %3062 = vmatmul.mubr.f32.vlgmr.msra.gmra.mrb[4].mxu0 %v4501_v45  ;;  %v3664_v45 = vpack.c.bf16 %v2435_v47, %v2434_v44 }
 0x175   : > { %3655 = vmatpush3.bf16.msra.mxu0 %v3652_v24  ;;  %3064 = vmatprep.mubr.f32.mxu0 %v4526_v55  ;;  %v3104_v42 = vpop.f32.mrb[14].mxu1  ;;  %v2441_v55 = vld [vmem:[%s5157_s3 + $0x268] sm:$0xff] }
 0x176   : > { %3657 = vmatprep.subr.bf16.mxu0 %v3656_v36  ;;  %v1090_v3 = vpop.f32.mrb[15].mxu1  ;;  %v3676_v9 = vpack.c.bf16 %v2441_v55, %v2440_v54 }
 0x178   : > { %3065 = vmatmul.mubr.f32.gmra.mrb[6].mxu0 %v4521_v52  ;;  %v3672_v52 = vpack.c.bf16 %v2439_v51, %v2438_v8 }
 0x179   : > { %3659 = vmatpush3.bf16.msra.mxu0 %v3656_v36  ;;  %3137 = vmatprep.mubr.f32.mxu0 %v1080_v2 }
 0x17a   : > { %3661 = vmatprep.subr.bf16.mxu0 %v3660_v4 }
 0x17d   : > { %3663 = vmatpush3.bf16.msra.mxu0 %v3660_v4 }
 0x17e   : > { %3665 = vmatprep.subr.bf16.mxu0 %v3664_v45 }
 0x181   : > { %3667 = vmatpush3.bf16.msra.mxu0 %v3664_v45 }
 0x182   : > { %3669 = vmatprep.subr.bf16.mxu0 %v3668_v6 }
 0x185   : > { %3671 = vmatpush3.bf16.msra.mxu0 %v3668_v6 }
 0x186   : > { %3673 = vmatprep.subr.bf16.mxu0 %v3672_v52 }
 0x189   : > { %3675 = vmatpush3.bf16.msra.mxu0 %v3672_v52 }
 0x18a   : > { %3677 = vmatprep.subr.bf16.mxu0 %v3676_v9 }
 0x18d   : > { %3679 = vmatpush3.bf16.msra.mxu0 %v3676_v9 }
 0x18e   : > { %3681 = vmatprep.subr.bf16.mxu0 %v3680_v58 }
 0x191   : > { %3683 = vmatpush3.bf16.msra.mxu0 %v3680_v58 }
 0x192   : > { %3738 = vmatprep.subr.bf16.mxu0 %v5163_v38 }
 0x194   : > { %3138 = vmatmul.mubr.f32.vlgmr.msra.gmra.mrb[4].mxu0 %v3101_v35 }
 0x195   : > { %3140 = vmatprep.mubr.f32.mxu0 %v1090_v3 }
 0x198   : > { %3141 = vmatmul.mubr.f32.gmra.mrb[6].mxu0 %v3104_v42 }
 0x1ac   : > { %v1586_v60 = vpop.permute.xlu0 %1585 }
 0x1ad   : > { %v1633_v61 = vsub.f32 %v4471_v33, %v1586_v60  ;;  %v1588_v12 = vpop.permute.xlu1 %1587 }
 0x1ae   : > { %v1634_v63 = vsub.f32 %v4486_v40, %v1588_v12 }
 0x1af   : > { %v1649_v1 = vmul.f32 %v1633_v61, %v1633_v61 }
 0x1b0   : > { %v1590_v14 = vpop.permute.xlu0 %1589  ;;  %v1650_v15 = vmul.f32 %v1634_v63, %v1634_v63 }
 0x1b1   : > { %v1635_v5 = vsub.f32 %v4480_v37, %v1590_v14  ;;  %v1592_v17 = vpop.permute.xlu1 %1591 }
 0x1b2   : > { %v3739_v16 = vpack.c.bf16 %v1650_v15, %v1649_v1  ;;  %v1636_v19 = vsub.f32 %v4497_v43, %v1592_v17 }
 0x1b3   : > { %v1651_v18 = vmul.f32 %v1635_v5, %v1635_v5 }
 0x1b4   : > { %v1594_v10 = vpop.permute.xlu0 %1593  ;;  %v1652_v25 = vmul.f32 %v1636_v19, %v1636_v19  ;;  %3740 = vmatpush3.bf16.msra.mxu0 %v3739_v16  ;;  %v5161_v16 = vmov 1.0   ;;  %v4692_v19 = vld [vmem:[%s4072_s9] sm:$0xff] }
 0x1b5   : > { %v1637_v20 = vsub.f32 %v4504_v46, %v1594_v10  ;;  %3741 = vmatprep.subr.bf16.mxu0 %v5163_v38  ;;  %v1596_v27 = vpop.permute.xlu1 %1595  ;;  %v5159_v10 = vmov 0.0  }
 0x1b6   : > { %v3742_v21 = vpack.c.bf16 %v1652_v25, %v1651_v18  ;;  %v1638_v23 = vsub.f32 %v4515_v50, %v1596_v27  ;;  %3151 = vmatprep.mubr.msk.f32.mxu1 %vm3980_vm0, %v5159_v10  ;;  %3256 = vmatprep.mubr.msk.f32.mxu0 %vm3980_vm0, %v5159_v10  ;;  %v1911_v18 = vrot.slane %v4692_v19, 1  ;;  %v4700_v27 = vld [vmem:[%s4072_s9 + $0x10] sm:$0xff] }
 0x1b7   : > { %v1653_v30 = vmul.f32 %v1637_v20, %v1637_v20  ;;  %v4696_v20 = vld [vmem:[%s4072_s9 + $0x8] sm:$0xff] }
 0x1b8   : > { %v1598_v28 = vpop.permute.xlu0 %1597  ;;  %3743 = vmatpush3.bf16.msra.mxu0 %v3742_v21  ;;  %v1654_v24 = vmul.f32 %v1638_v23, %v1638_v23  ;;  %v1912_v25 = vrot.slane %v4696_v20, 1  ;;  %v4704_v21 = vld [vmem:[%s4072_s9 + $0x18] sm:$0xff] }
 0x1b9   : > { %v1639_v31 = vsub.f32 %v4524_v53, %v1598_v28  ;;  %3744 = vmatprep.subr.bf16.mxu0 %v5163_v38  ;;  %v1914_v28 = vrot.slane %v4700_v27, 1  ;;  %v1916_v23 = vrot.slane %v4704_v21, 1 }
 0x1ba   : > { %v3745_v35 = vpack.c.bf16 %v1654_v24, %v1653_v30  ;;  %v1913_v30 = vsel %vm1746_vm1, %v1911_v18, %v1912_v25 }
 0x1bb   : > { %v1655_v2 = vmul.f32 %v1639_v31, %v1639_v31  ;;  %v1915_v31 = vsel %vm1746_vm1, %v1912_v25, %v1914_v28  ;;  %v1917_v24 = vsel %vm1746_vm1, %v1914_v28, %v1916_v23  ;;  %v4757_v25 = vld [vmem:[%s4072_s9 + $0x40] sm:$0xff] }
 0x1bc   : > { %v1602_v34 = vpop.permute.xlu0 %1601  ;;  %3746 = vmatpush3.bf16.msra.mxu0 %v3745_v35  ;;  %v4713_v35 = vsub.f32 %v4700_v27, %v1917_v24  ;;  %v1926_v28 = vrot.slane %v4757_v25, 1 }
 0x1bd   : > { %v1641_v39 = vsub.f32 %v4543_v59, %v1602_v34  ;;  %3747 = vmatprep.subr.bf16.mxu0 %v5163_v38  ;;  %v1959_v34 = vsub.f32 %v4696_v20, %v1915_v31 }
 0x1bf   : > { %v1657_v47 = vmul.f32 %v1641_v39, %v1641_v39  ;;  %v4720_v39 = vld [vmem:[%s4072_s9 + $0x28] sm:$0xff] }
 0x1c8   : > { %v1600_v32 = vpop.permute.xlu1 %1599 }
 0x1c9   : > { %v1640_v36 = vsub.f32 %v4537_v57, %v1600_v32  ;;  %v1606_v4 = vpop.permute.xlu0 %1605  ;;  %v1958_v32 = vsub.f32 %v4692_v19, %v1913_v30 }
 0x1ca   : > { %v1643_v45 = vsub.f32 %v4559_v0, %v1606_v4  ;;  %v2089_v4 = vrot.slane %v1959_v34, 1 }
 0x1cb   : > { %v1656_v41 = vmul.f32 %v1640_v36, %v1640_v36  ;;  %v4716_v36 = vld [vmem:[%s4072_s9 + $0x20] sm:$0xff] }
 0x1cc   : > { %v1604_v42 = vpop.permute.xlu1 %1603  ;;  %v1659_v52 = vmul.f32 %v1643_v45, %v1643_v45 }
 0x1cd   : > { %v3748_v3 = vpack.c.bf16 %v1656_v41, %v1655_v2  ;;  %v1642_v44 = vsub.f32 %v4554_v62, %v1604_v42  ;;  %v1610_v6 = vpop.permute.xlu0 %1609  ;;  %v1918_v2 = vrot.slane %v4716_v36, 1  ;;  %v1920_v41 = vrot.slane %v4720_v39, 1 }
 0x1ce   : > { %v1645_v54 = vsub.f32 %v4575_v13, %v1610_v6  ;;  %v2088_v42 = vrot.slane %v1958_v32, 1 }
 0x1cf   : > { %v1658_v48 = vmul.f32 %v1642_v44, %v1642_v44  ;;  %3749 = vmatpush3.bf16.msra.mxu0 %v3748_v3  ;;  %v2091_v3 = vrot.slane %v4713_v35, 1  ;;  %v1919_v44 = vsel %vm1746_vm1, %v1916_v23, %v1918_v2  ;;  %v4761_v23 = vld [vmem:[%s4072_s9 + $0x48] sm:$0xff] }
 0x1d0   : > { %v1608_v49 = vpop.permute.xlu1 %1607  ;;  %3750 = vmatprep.subr.bf16.mxu0 %v5163_v38  ;;  %v1661_v60 = vmul.f32 %v1645_v54, %v1645_v54  ;;  %v2090_v45 = vsel %vm1746_vm1, %v2088_v42, %v2089_v4  ;;  %v1928_v30 = vrot.slane %v4761_v23, 1 }
 0x1d1   : > { %v3751_v8 = vpack.c.bf16 %v1658_v48, %v1657_v47  ;;  %v1644_v51 = vsub.f32 %v4570_v7, %v1608_v49  ;;  %v1614_v56 = vpop.permute.xlu0 %1613  ;;  %v1921_v47 = vsel %vm1746_vm1, %v1918_v2, %v1920_v41  ;;  %v2092_v48 = vsel %vm1746_vm1, %v2089_v4, %v2091_v3 }
 0x1d2   : > { %v1647_v61 = vsub.f32 %v4591_v26, %v1614_v56  ;;  %v1961_v49 = vsub.f32 %v4704_v21, %v1919_v44  ;;  %v2135_v6 = vsub.f32 %v1958_v32, %v2090_v45  ;;  %v1929_v4 = vsel %vm1746_vm1, %v1926_v28, %v1928_v30  ;;  %v4779_v45 = vld [vmem:[%s4072_s9 + $0x50] sm:$0xff] }
 0x1d3   : > { %v1660_v55 = vmul.f32 %v1644_v51, %v1644_v51  ;;  %3752 = vmatpush3.bf16.msra.mxu0 %v3751_v8  ;;  %v2136_v8 = vsub.f32 %v1959_v34, %v2092_v48  ;;  %v4730_v51 = vsub.f32 %v4716_v36, %v1921_v47  ;;  %v4776_v47 = vsub.f32 %v4757_v25, %v1929_v4 }
 0x1d4   : > { %v1612_v9 = vpop.permute.xlu1 %1611  ;;  %3753 = vmatprep.subr.bf16.mxu0 %v5163_v38  ;;  %v1663_v5 = vmul.f32 %v1647_v61, %v1647_v61  ;;  %v1930_v48 = vrot.slane %v4779_v45, 1  ;;  %v1976_v4 = vmul.f32 %v4713_v35, %v4713_v35 }
 0x1d5   : > { %v3754_v11 = vpack.c.bf16 %v1660_v55, %v1659_v52  ;;  %v1646_v58 = vsub.f32 %v4586_v22, %v1612_v9  ;;  %v4733_v52 = vld [vmem:[%s4072_s9 + $0x30] sm:$0xff]  ;;  %v2093_v55 = vrot.slane %v1961_v49, 1  ;;  %v4737_v9 = vld [vmem:[%s4072_s9 + $0x38] sm:$0xff] }
 0x1d6   : > { %v1922_v54 = vrot.slane %v4733_v52, 1  ;;  %v1924_v56 = vrot.slane %v4737_v9, 1 }
 0x1d7   : > { %v1662_v12 = vmul.f32 %v1646_v58, %v1646_v58  ;;  %3755 = vmatpush3.bf16.msra.mxu0 %v3754_v11  ;;  %v4740_v11 = vmul.f32 %v2135_v6, %v2135_v6  ;;  %v4742_v58 = vmul.f32 %v2136_v8, %v2136_v8  ;;  %v2094_v61 = vsel %vm1746_vm1, %v2091_v3, %v2093_v55 }
 0x1d8   : > { %v1616_v14 = vpop.permute.xlu1 %1615  ;;  %3756 = vmatprep.subr.bf16.mxu0 %v5163_v38  ;;  %v1927_v42 = vsel %vm1746_vm1, %v1924_v56, %v1926_v28  ;;  %v1974_v8 = vmul.f32 %v1958_v32, %v1958_v32 }
 0x1d9   : > { %v3757_v63 = vpack.c.bf16 %v1662_v12, %v1661_v60  ;;  %v1648_v1 = vsub.f32 %v4602_v29, %v1616_v14  ;;  %5178 = vst [vmem:[#allocation6_spill] sm:$0xff] %v4740_v11  ;;  %5179 = vst [vmem:[#allocation7_spill] sm:$0xff] %v4742_v58  ;;  %v2095_v60 = vrot.slane %v4730_v51, 1  ;;  %v1923_v12 = vsel %vm1746_vm1, %v1920_v41, %v1922_v54 }
 0x1da   : > { %v1925_v14 = vsel %vm1746_vm1, %v1922_v54, %v1924_v56  ;;  %v4773_v44 = vsub.f32 %v4737_v9, %v1927_v42  ;;  %v1975_v54 = vmul.f32 %v1959_v34, %v1959_v34 }
 0x1db   : > { %v1664_v15 = vmul.f32 %v1648_v1, %v1648_v1  ;;  %3758 = vmatpush3.bf16.msra.mxu0 %v3757_v63  ;;  %v2096_v1 = vsel %vm1746_vm1, %v2093_v55, %v2095_v60  ;;  %v4754_v18 = vsub.f32 %v4733_v52, %v1925_v14 }
 0x1dc   : > { %3759 = vmatprep.subr.bf16.mxu0 %v5163_v38 }
 0x1dd   : > { %v3760_v17 = vpack.c.bf16 %v1664_v15, %v1663_v5  ;;  %v2137_v5 = vsub.f32 %v4713_v35, %v2094_v61  ;;  %v1963_v15 = vsub.f32 %v4720_v39, %v1923_v12  ;;  %v2099_v41 = vrot.slane %v4754_v18, 1 }
 0x1de   : > { %v2101_v61 = vrot.slane %v4773_v44, 1  ;;  %v2103_v12 = vrot.slane %v4776_v47, 1 }
 0x1df   : > { %3761 = vmatpush3.bf16.msra.mxu0 %v3760_v17  ;;  %v2138_v17 = vsub.f32 %v1961_v49, %v2096_v1  ;;  %v4764_v31 = vmul.f32 %v2137_v5, %v2137_v5  ;;  %v2097_v24 = vrot.slane %v1963_v15, 1  ;;  %v3788_v1 = vpack.c.bf16 %v1975_v54, %v1974_v8  ;;  %v4823_v54 = vld [vmem:[%s4072_s9 + $0x68] sm:$0xff] }
 0x1e0   : > { %3787 = vmatprep.subr.bf16.mxu0 %v5163_v38  ;;  %v1931_v5 = vsel %vm1746_vm1, %v1928_v30, %v1930_v48  ;;  %v2104_v42 = vsel %vm1746_vm1, %v2101_v61, %v2103_v12 }
 0x1e1   : > { %5180 = vst [vmem:[#allocation8_spill] sm:$0xff] %v4764_v31  ;;  %v4766_v2 = vmul.f32 %v2138_v17, %v2138_v17  ;;  %v2098_v3 = vsel %vm1746_vm1, %v2095_v60, %v2097_v24  ;;  %v2100_v55 = vsel %vm1746_vm1, %v2097_v24, %v2099_v41  ;;  %v4791_v17 = vld [vmem:[%s4072_s9 + $0x58] sm:$0xff]  ;;  %v2102_v24 = vsel %vm1746_vm1, %v2099_v41, %v2101_v61 }
 0x1e2   : > { %3257 = vmatmul.mubr.f32.vlgmr.msra.gmra.mrb[8].mxu0 %v5161_v16  ;;  %v2139_v56 = vsub.f32 %v4730_v51, %v2098_v3  ;;  %v2140_v60 = vsub.f32 %v1963_v15, %v2100_v55  ;;  %v1932_v32 = vrot.slane %v4791_v17, 1  ;;  %v1977_v3 = vmul.f32 %v1961_v49, %v1961_v49  ;;  %v232_v16 = vld [vmem:[%s4833_s29 + $0x8] sm:$0xff] }
 0x1e3   : > { %3326 = vmatprep.mubr.msk.f32.mxu0 %vm3980_vm0, %v5159_v10  ;;  %5181 = vst [vmem:[#allocation9_spill] sm:$0xff] %v4766_v2  ;;  %3789 = vmatpush3.bf16.msra.mxu0 %v3788_v1  ;;  %v2141_v30 = vsub.f32 %v4754_v18, %v2102_v24  ;;  %v2142_v8 = vsub.f32 %v4773_v44, %v2104_v42  ;;  %v234_v2 = vld [vmem:[%s4833_s29 + $0x18] sm:$0xff] }
 0x1e4   : > { %v4794_v34 = vmul.f32 %v2139_v56, %v2139_v56  ;;  %v4796_v28 = vmul.f32 %v2140_v60, %v2140_v60  ;;  %3790 = vmatprep.subr.bf16.mxu0 %v5163_v38  ;;  %v1933_v41 = vsel %vm1746_vm1, %v1930_v48, %v1932_v32  ;;  %v1967_v55 = vsub.f32 %v4761_v23, %v1931_v5  ;;  %v4811_v56 = vld [vmem:[%s4072_s9 + $0x60] sm:$0xff]  ;;  %v4827_v5 = vld [vmem:[%s4072_s9 + $0x70] sm:$0xff] }
 0x1e5   : > { %v1934_v35 = vrot.slane %v4811_v56, 1  ;;  %v3791_v49 = vpack.c.bf16 %v1977_v3, %v1976_v4  ;;  %v4814_v60 = vmul.f32 %v2141_v30, %v2141_v30  ;;  %v4816_v61 = vmul.f32 %v2142_v8, %v2142_v8 }
 0x1e6   : > { %5182 = vst [vmem:[#allocation10_spill] sm:$0xff] %v4794_v34  ;;  %5183 = vst [vmem:[#allocation11_spill] sm:$0xff] %v4796_v28  ;;  %v4819_v1 = vsub.f32 %v4779_v45, %v1933_v41  ;;  %v2105_v24 = vrot.slane %v1967_v55, 1  ;;  %v1936_v48 = vrot.slane %v4823_v54, 1  ;;  %v1938_v6 = vrot.slane %v4827_v5, 1 }
 0x1e7   : > { %5184 = vst [vmem:[#allocation12_spill] sm:$0xff] %v4814_v60  ;;  %5185 = vst [vmem:[#allocation13_spill] sm:$0xff] %v4816_v61  ;;  %v1935_v42 = vsel %vm1746_vm1, %v1932_v32, %v1934_v35  ;;  %3792 = vmatpush3.bf16.msra.mxu0 %v3791_v49  ;;  %v1978_v32 = vmul.f32 %v4730_v51, %v4730_v51  ;;  %v1979_v3 = vmul.f32 %v1963_v15, %v1963_v15  ;;  %v5186_v60 = vmov 0.0|0.0  }
 0x1e8   : > { %v2107_v30 = vrot.slane %v4819_v1, 1  ;;  %3793 = vmatprep.subr.bf16.mxu0 %v5163_v38  ;;  %v2106_v8 = vsel %vm1746_vm1, %v2103_v12, %v2105_v24  ;;  %v1937_v41 = vsel %vm1746_vm1, %v1934_v35, %v1936_v48  ;;  %v4844_v63 = vsub.f32 %v4791_v17, %v1935_v42  ;;  %v4855_v12 = vld [vmem:[%s4072_s9 + $0x78] sm:$0xff]  ;;  %s203_s9 = sand.u32 1, %s3968_s16  }
 0x1e9   : > { %v1939_v49 = vsel %vm1746_vm1, %v1936_v48, %v1938_v6  ;;  %v3794_v4 = vpack.c.bf16 %v1979_v3, %v1978_v32  ;;  %v2143_v51 = vsub.f32 %v4776_v47, %v2106_v8  ;;  %v4850_v15 = vsub.f32 %v4811_v56, %v1937_v41  ;;  %v231_v48 = vld [vmem:[%s4833_s29] sm:$0xff]  ;;  %s204_s7 = scalar_lea.vmem [#allocation2], %s203_s9  ;;  %s2277_s12 = scalar_lea.sflag [#allocation3], %s203_s9 }
 0x1ea   : > { %v2108_v10 = vsel %vm1746_vm1, %v2105_v24, %v2107_v30  ;;  %v2109_v38 = vrot.slane %v4844_v63, 1  ;;  %v1940_v35 = vrot.slane %v4855_v12, 1  ;;  %v4859_v42 = vsub.f32 %v4823_v54, %v1939_v49  ;;  %s2289_s8 = sshll.u32 %s204_s7, 4  ;;  %s5114_s8 = int_to_ptr.vmem [resolvable:$true] %s2289_s8 }
 0x1eb   : > { %v2144_v14 = vsub.f32 %v1967_v55, %v2108_v10  ;;  %3795 = vmatpush3.bf16.msra.mxu0 %v3794_v4  ;;  %v4862_v32 = vmul.f32 %v2143_v51, %v2143_v51  ;;  %v1980_v24 = vmul.f32 %v4754_v18, %v4754_v18  ;;  %v1981_v10 = vmul.f32 %v4773_v44, %v4773_v44  ;;  %s3914_s13 = scalar_lea.vmem %s5114_s8, 16  ;;  %p3921_p0 = scmp.lt.s32.totalorder %s5114_s8, %s3919_s14 }
 0x1ec   : > { %v2111_v3 = vrot.slane %v4850_v15, 1  ;;  %3796 = vmatprep.subr.bf16.mxu0 %v5186_v60  ;;  %v2110_v49 = vsel %vm1746_vm1, %v2107_v30, %v2109_v38  ;;  %v1941_v4 = vsel %vm1746_vm1, %v1938_v6, %v1940_v35  ;;  %v2113_v51 = vrot.slane %v4859_v42, 1  ;;  %v233_v6 = vld [vmem:[%s4833_s29 + $0x10] sm:$0xff]  ;;  %p3915_p11 = scmp.ne.s32.totalorder %s5114_s8, %s3914_s13  ;;  %p3922_p1 = scmp.lt.s32.totalorder %s3920_s20, %s3914_s13 }
 0x1ed   : > { %v4869_v41 = vmul.f32 %v2144_v14, %v2144_v14  ;;  %v3797_v18 = vpack.c.bf16 %v1981_v10, %v1980_v24  ;;  %v2145_v44 = vsub.f32 %v4819_v1, %v2110_v49  ;;  %v1972_v30 = vsub.f32 %v4827_v5, %v1941_v4 }
 0x1ee   : > { %v2112_v28 = vsel %vm1746_vm1, %v2109_v38, %v2111_v3  ;;  %v1983_v38 = vmul.f32 %v1967_v55, %v1967_v55  ;;  %p3916_p12 = pnand %p3915_p11, %p4048_p5  ;;  %p3923_p2 = por %p3922_p1, %p3921_p0 }
 0x1ef   : > { %v2146_v11 = vsub.f32 %v4844_v63, %v2112_v28  ;;  %3798 = vmatpush3.bf16.msra.mxu0 %v3797_v18  ;;  %v4883_v29 = vmul.f32 %v2145_v44, %v2145_v44  ;;  %v2115_v28 = vrot.slane %v1972_v30, 1  ;;  %v1973_v18 = vsub.f32 %v4855_v12, %v1940_v35 }
 0x1f0   : > { %3799 = vmatprep.subr.bf16.mxu0 %v5186_v60  ;;  %v1298_v35 = vand.u32 2147483647, %v4696_v20  ;;  %p3917_p13 = pneg %p3916_p12 }
 0x1f2   : > { %p3924_p3 = pnand %p3923_p2, %p3917_p13 }
 0x267   : > { %v3139_v8 = vpop.f32.mrb[4].mxu0 }
 0x268   : > { %v1206_v61 = vsub.f32 %v3139_v8, %v232_v16  ;;  %v1182_v34 = vpop.f32.mrb[5].mxu0  ;;  %v1982_v16 = vmul.f32 %v4776_v47, %v4776_v47 }
 0x269   : > { %v1205_v31 = vsub.f32 %v1182_v34, %v231_v48  ;;  %v4887_v34 = vmul.f32 %v2146_v11, %v2146_v11  ;;  %v2114_v48 = vsel %vm1746_vm1, %v2111_v3, %v2113_v51  ;;  %v2116_v11 = vsel %vm1746_vm1, %v2113_v51, %v2115_v28 }
 0x26a   : > { %v1210_v58 = vand.u32 2147483647, %v1206_v61  ;;  %v3800_v61 = vpack.c.bf16 %v1983_v38, %v1982_v16  ;;  %v2147_v4 = vsub.f32 %v4850_v15, %v2114_v48  ;;  %v2148_v55 = vsub.f32 %v4859_v42, %v2116_v11 }
 0x26b   : > { %v1209_v24 = vand.u32 2147483647, %v1205_v31  ;;  %v3142_v10 = vpop.f32.mrb[6].mxu0  ;;  %v3828_v31 = vpack.c.bf16 %v4887_v34, %v4883_v29  ;;  %v1986_v48 = vmul.f32 %v4850_v15, %v4850_v15  ;;  %v5188_v11 = vmov 1.0  }
 0x26c   : > { %v1208_v8 = vsub.f32 %v3142_v10, %v234_v2  ;;  %v1192_v49 = vpop.f32.mrb[7].mxu0  ;;  %3801 = vmatpush3.bf16.msra.mxu0 %v3800_v61  ;;  %v4897_v3 = vmul.f32 %v2147_v4, %v2147_v4  ;;  %v1984_v2 = vmul.f32 %v4819_v1, %v4819_v1  ;;  %v4906_v51 = vmul.f32 %v2148_v55, %v2148_v55 }
 0x26d   : > { %v3685_v44 = vpack.c.bf16 %v1210_v58, %v1209_v24  ;;  %v1207_v14 = vsub.f32 %v1192_v49, %v233_v6  ;;  %3802 = vmatprep.subr.bf16.mxu0 %v5186_v60  ;;  %v1985_v58 = vmul.f32 %v4844_v63, %v4844_v63  ;;  %v2117_v6 = vrot.slane %v1973_v18, 1 }
 0x26e   : > { %v1212_v47 = vand.u32 2147483647, %v1208_v8  ;;  %v1987_v63 = vmul.f32 %v4859_v42, %v4859_v42  ;;  %v5187_v8 = vand.u32 2147483647, %v4692_v19  ;;  %v1299_v61 = vand.u32 2147483647, %v4700_v27 }
 0x26f   : > { %v1211_v16 = vand.u32 2147483647, %v1207_v14  ;;  %3686 = vmatpush3.bf16.msra.mxu1 %v3685_v44  ;;  %v3803_v24 = vpack.c.bf16 %v1985_v58, %v1984_v2  ;;  %v2118_v10 = vsel %vm1746_vm1, %v2115_v28, %v2117_v6  ;;  %v2150_v1 = vsub.f32 %v1973_v18, %v2117_v6 }
 0x270   : > { %3687 = vmatprep.subr.bf16.mxu1 %v5186_v60  ;;  %v3831_v14 = vpack.c.bf16 %v4906_v51, %v4897_v3  ;;  %v2149_v20 = vsub.f32 %v1972_v30, %v2118_v10  ;;  %v3691_v49 = vpack.c.bf16 %v1298_v35, %v5187_v8  ;;  %v1300_v4 = vand.u32 2147483647, %v4704_v21 }
 0x271   : > { %v3688_v38 = vpack.c.bf16 %v1212_v47, %v1211_v16  ;;  %3804 = vmatpush3.bf16.msra.mxu0 %v3803_v24  ;;  %v4919_v28 = vmul.f32 %v2150_v1, %v2150_v1  ;;  %v3806_v15 = vpack.c.bf16 %v1987_v63, %v1986_v48  ;;  %v1988_v42 = vmul.f32 %v1972_v30, %v1972_v30 }
 0x272   : > { %v4922_v44 = vmul.f32 %v2149_v20, %v2149_v20  ;;  %3805 = vmatprep.subr.bf16.mxu0 %v5186_v60  ;;  %v1989_v27 = vmul.f32 %v1973_v18, %v1973_v18  ;;  %v3694_v21 = vpack.c.bf16 %v1300_v4, %v1299_v61  ;;  %v1301_v47 = vand.u32 2147483647, %v4716_v36  ;;  %v5199_v36 = vld [vmem:[#allocation11_spill] sm:$0xff] }
 0x273   : > { %3689 = vmatpush3.bf16.msra.mxu1 %v3688_v38  ;;  %v1302_v55 = vand.u32 2147483647, %v4720_v39  ;;  %v5189_v2 = vmov 0.0   ;;  %v1303_v30 = vand.u32 2147483647, %v4733_v52  ;;  %v1476_v63 = vmul.f32 %v4504_v46, %v4504_v46 }
 0x274   : > { %3690 = vmatprep.subr.bf16.mxu1 %v5186_v60  ;;  %v3834_v19 = vpack.c.bf16 %v4919_v28, %v4922_v44  ;;  %v3809_v16 = vpack.c.bf16 %v1989_v27, %v1988_v42  ;;  %v1304_v18 = vand.u32 2147483647, %v4737_v9  ;;  %v1305_v58 = vand.u32 2147483647, %v4757_v25 }
 0x275   : > { %3807 = vmatpush3.bf16.msra.mxu0 %v3806_v15  ;;  %v3697_v35 = vpack.c.bf16 %v1302_v55, %v1301_v47  ;;  %v1306_v52 = vand.u32 2147483647, %v4761_v23  ;;  %v1307_v6 = vand.u32 2147483647, %v4779_v45  ;;  %v1308_v38 = vand.u32 2147483647, %v4791_v17 }
 0x276   : > { %3152 = vmatmul.mubr.msk.f32.vlgmr.msra.gmra.mrb[16].mxu1 %vm1213_vm2, %v5188_v11  ;;  %3808 = vmatprep.subr.bf16.mxu0 %v5186_v60  ;;  %v3700_v39 = vpack.c.bf16 %v1304_v18, %v1303_v30  ;;  %v1309_v10 = vand.u32 2147483647, %v4811_v56  ;;  %v1310_v25 = vand.u32 2147483647, %v4823_v54  ;;  %v1311_v1 = vand.u32 2147483647, %v4827_v5 }
 0x277   : > { %3692 = vmatpush3.bf16.msra.mxu1 %v3691_v49  ;;  %3186 = vmatprep.mubr.msk.f32.mxu1 %vm3980_vm0, %v5189_v2  ;;  %v3703_v9 = vpack.c.bf16 %v1306_v52, %v1305_v58  ;;  %v3706_v24 = vpack.c.bf16 %v1308_v38, %v1307_v6  ;;  %v1312_v20 = vand.u32 2147483647, %v4855_v12  ;;  %v1472_v17 = vmul.f32 %v4471_v33, %v4471_v33 }
 0x278   : > { %3693 = vmatprep.subr.bf16.mxu1 %v5186_v60  ;;  %v3709_v23 = vpack.c.bf16 %v1310_v25, %v1309_v10  ;;  %v1473_v54 = vmul.f32 %v4486_v40, %v4486_v40  ;;  %v1474_v5 = vmul.f32 %v4480_v37, %v4480_v37  ;;  %v1475_v12 = vmul.f32 %v4497_v43, %v4497_v43 }
 0x279   : > { %3811 = vmatpush3.bf16.msk.msra.mxu0 %vm4939_vm4, %v3809_v16  ;;  %v3712_v45 = vpack.c.bf16 %v1312_v20, %v1311_v1  ;;  %v1477_v8 = vmul.f32 %v4515_v50, %v4515_v50  ;;  %v1478_v61 = vmul.f32 %v4524_v53, %v4524_v53  ;;  %v1479_v4 = vmul.f32 %v4537_v57, %v4537_v57 }
 0x27a   : > { %v3715_v56 = vpack.c.bf16 %v1473_v54, %v1472_v17  ;;  %v3718_v48 = vpack.c.bf16 %v1475_v12, %v1474_v5  ;;  %v1480_v42 = vmul.f32 %v4543_v59, %v4543_v59  ;;  %v1481_v27 = vmul.f32 %v4554_v62, %v4554_v62  ;;  %v5192_v17 = vld [vmem:[#allocation5_spill] sm:$0xff] }
 0x27b   : > { %3695 = vmatpush3.bf16.msra.mxu1 %v3694_v21  ;;  %v3721_v49 = vpack.c.bf16 %v1477_v8, %v1476_v63  ;;  %v3724_v15 = vpack.c.bf16 %v1479_v4, %v1478_v61  ;;  %v1747_v21 = vrot.slane %v4471_v33, 1  ;;  %v1748_v47 = vrot.slane %v4486_v40, 1 }
 0x27c   : > { %3696 = vmatprep.subr.bf16.mxu1 %v5186_v60  ;;  %3327 = vmatmul.mubr.msk.f32.vlgmr.msra.gmra.mrb[10].mxu0 %vm1558_vm5, %v5188_v11  ;;  %v1750_v55 = vrot.slane %v4480_v37, 1  ;;  %v3727_v16 = vpack.c.bf16 %v1481_v27, %v1480_v42  ;;  %v1483_v30 = vmul.f32 %v4570_v7, %v4570_v7  ;;  %v1752_v18 = vrot.slane %v4497_v43, 1 }
 0x27d   : > { %v1749_v58 = vsel %vm1746_vm1, %v1747_v21, %v1748_v47  ;;  %v1485_v6 = vmul.f32 %v4586_v22, %v4586_v22  ;;  %v1758_v10 = vrot.slane %v4524_v53, 1  ;;  %v1487_v54 = vmul.f32 %v5192_v17, %v5192_v17 }
 0x27e   : > { %v1751_v38 = vsel %vm1746_vm1, %v1748_v47, %v1750_v55  ;;  %v1794_v25 = vsub.f32 %v4471_v33, %v1749_v58  ;;  %v1753_v1 = vsel %vm1746_vm1, %v1750_v55, %v1752_v18  ;;  %v1762_v61 = vrot.slane %v4543_v59, 1 }
 0x27f   : > { %3698 = vmatpush3.bf16.msra.mxu1 %v3697_v35  ;;  %v1482_v35 = vmul.f32 %v4559_v0, %v4559_v0  ;;  %v1796_v12 = vsub.f32 %v4480_v37, %v1753_v1  ;;  %v1766_v27 = vrot.slane %v4559_v0, 1  ;;  %v1768_v58 = vrot.slane %v4570_v7, 1 }
 0x280   : > { %3699 = vmatprep.subr.bf16.mxu1 %v5186_v60  ;;  %v1810_v5 = vmul.f32 %v1794_v25, %v1794_v25  ;;  %v1776_v1 = vrot.slane %v5192_v17, 1 }
 0x281   : > { %v3730_v52 = vpack.c.bf16 %v1483_v30, %v1482_v35  ;;  %v1812_v4 = vmul.f32 %v1796_v12, %v1796_v12  ;;  %v1769_v25 = vsel %vm1746_vm1, %v1766_v27, %v1768_v58 }
 0x283   : > { %3701 = vmatpush3.bf16.msra.mxu1 %v3700_v39  ;;  %v1754_v39 = vrot.slane %v4504_v46, 1 }
 0x284   : > { %3702 = vmatprep.subr.bf16.mxu1 %v5186_v60 }
 0x287   : > { %3704 = vmatpush3.bf16.msra.mxu1 %v3703_v9  ;;  %v1484_v9 = vmul.f32 %v4575_v13, %v4575_v13 }
 0x288   : > { %3705 = vmatprep.subr.bf16.mxu1 %v5186_v60 }
 0x289   : > { %v3733_v20 = vpack.c.bf16 %v1485_v6, %v1484_v9 }
 0x28b   : > { %3707 = vmatpush3.bf16.msra.mxu1 %v3706_v24  ;;  %v1756_v24 = vrot.slane %v4515_v50, 1 }
 0x28c   : > { %3708 = vmatprep.subr.bf16.mxu1 %v5186_v60 }
 0x28d   : > { %v1757_v63 = vsel %vm1746_vm1, %v1754_v39, %v1756_v24  ;;  %v1759_v8 = vsel %vm1746_vm1, %v1756_v24, %v1758_v10 }
 0x28e   : > { %v1798_v42 = vsub.f32 %v4504_v46, %v1757_v63  ;;  %v1799_v37 = vsub.f32 %v4515_v50, %v1759_v8 }
 0x28f   : > { %3710 = vmatpush3.bf16.msra.mxu1 %v3709_v23  ;;  %v1795_v23 = vsub.f32 %v4486_v40, %v1751_v38 }
 0x290   : > { %3711 = vmatprep.subr.bf16.mxu1 %v5186_v60  ;;  %v1815_v50 = vmul.f32 %v1799_v37, %v1799_v37 }
 0x293   : > { %3713 = vmatpush3.bf16.msra.mxu1 %v3712_v45  ;;  %v1486_v45 = vmul.f32 %v4591_v26, %v4591_v26 }
 0x294   : > { %3714 = vmatprep.subr.bf16.mxu1 %v5186_v60 }
 0x295   : > { %v3736_v40 = vpack.c.bf16 %v1487_v54, %v1486_v45 }
 0x296   : > { %3187 = vmatmul.mubr.f32.vlgmr.msra.gmra.mrb[18].mxu1 %v5188_v11 }
 0x297   : > { %3716 = vmatpush3.bf16.msra.mxu1 %v3715_v56  ;;  %3221 = vmatprep.mubr.msk.f32.mxu1 %vm3980_vm0, %v5189_v2  ;;  %v1755_v56 = vsel %vm1746_vm1, %v1752_v18, %v1754_v39 }
 0x298   : > { %3717 = vmatprep.subr.bf16.mxu1 %v5186_v60  ;;  %v1797_v33 = vsub.f32 %v4497_v43, %v1755_v56  ;;  %v1764_v43 = vrot.slane %v4554_v62, 1 }
 0x29a   : > { %v1765_v18 = vsel %vm1746_vm1, %v1762_v61, %v1764_v43  ;;  %v1767_v39 = vsel %vm1746_vm1, %v1764_v43, %v1766_v27  ;;  %v5194_v27 = vld [vmem:[#allocation6_spill] sm:$0xff] }
 0x29b   : > { %3719 = vmatpush3.bf16.msra.mxu1 %v3718_v48  ;;  %v1811_v48 = vmul.f32 %v1795_v23, %v1795_v23  ;;  %v1802_v9 = vsub.f32 %v4543_v59, %v1765_v18  ;;  %v1803_v6 = vsub.f32 %v4554_v62, %v1767_v39  ;;  %v1804_v62 = vsub.f32 %v4559_v0, %v1769_v25 }
 0x29c   : > { %3720 = vmatprep.subr.bf16.mxu1 %v5186_v60  ;;  %v1809_v0 = vsub.f32 %v5192_v17, %v1776_v1  ;;  %v5193_v17 = vld [vmem:[#allocation7_spill] sm:$0xff] }
 0x29d   : > { %v3763_v21 = vpack.c.bf16 %v1811_v48, %v1810_v5  ;;  %v1819_v59 = vmul.f32 %v1803_v6, %v1803_v6 }
 0x29f   : > { %3722 = vmatpush3.bf16.msra.mxu1 %v3721_v49  ;;  %v1760_v49 = vrot.slane %v4537_v57, 1 }
 0x2a0   : > { %3723 = vmatprep.subr.bf16.mxu1 %v5186_v60 }
 0x2a1   : > { %v1761_v47 = vsel %vm1746_vm1, %v1758_v10, %v1760_v49  ;;  %v1763_v55 = vsel %vm1746_vm1, %v1760_v49, %v1762_v61  ;;  %v1774_v10 = vrot.slane %v4591_v26, 1 }
 0x2a2   : > { %v1800_v35 = vsub.f32 %v4524_v53, %v1761_v47  ;;  %v1801_v30 = vsub.f32 %v4537_v57, %v1763_v55  ;;  %v1772_v57 = vrot.slane %v4586_v22, 1  ;;  %v5196_v47 = vld [vmem:[#allocation9_spill] sm:$0xff]  ;;  %v5197_v55 = vld [vmem:[#allocation8_spill] sm:$0xff] }
 0x2a3   : > { %3725 = vmatpush3.bf16.msra.mxu1 %v3724_v15  ;;  %v1813_v15 = vmul.f32 %v1797_v33, %v1797_v33  ;;  %v1777_v12 = vsel %vm1746_vm1, %v1774_v10, %v1776_v1 }
 0x2a4   : > { %3726 = vmatprep.subr.bf16.mxu1 %v5186_v60  ;;  %v1816_v24 = vmul.f32 %v1800_v35, %v1800_v35  ;;  %v1817_v53 = vmul.f32 %v1801_v30, %v1801_v30  ;;  %v1775_v5 = vsel %vm1746_vm1, %v1772_v57, %v1774_v10  ;;  %v5202_v35 = vld [vmem:[#allocation13_spill] sm:$0xff]  ;;  %v5203_v30 = vld [vmem:[#allocation12_spill] sm:$0xff] }
 0x2a5   : > { %v3766_v46 = vpack.c.bf16 %v1813_v15, %v1812_v4  ;;  %v1807_v8 = vsub.f32 %v4586_v22, %v1775_v5  ;;  %v5204_v18 = vpack.c.bf16 %v5202_v35, %v5203_v30 }
 0x2a6   : > { %v3772_v45 = vpack.c.bf16 %v1817_v53, %v1816_v24 }
 0x2a7   : > { %3728 = vmatpush3.bf16.msra.mxu1 %v3727_v16  ;;  %v1814_v16 = vmul.f32 %v1798_v42, %v1798_v42  ;;  %v1823_v4 = vmul.f32 %v1807_v8, %v1807_v8 }
 0x2a8   : > { %3729 = vmatprep.subr.bf16.mxu1 %v5186_v60 }
 0x2a9   : > { %v3769_v38 = vpack.c.bf16 %v1815_v50, %v1814_v16  ;;  %v5200_v16 = vld [vmem:[#allocation10_spill] sm:$0xff] }
 0x2aa   : > { %v5201_v50 = vpack.c.bf16 %v5199_v36, %v5200_v16 }
 0x2ab   : > { %3731 = vmatpush3.bf16.msra.mxu1 %v3730_v52  ;;  %v1770_v52 = vrot.slane %v4575_v13, 1 }
 0x2ac   : > { %3732 = vmatprep.subr.bf16.mxu1 %v5186_v60 }
 0x2ad   : > { %v1771_v23 = vsel %vm1746_vm1, %v1768_v58, %v1770_v52  ;;  %v1773_v56 = vsel %vm1746_vm1, %v1770_v52, %v1772_v57 }
 0x2ae   : > { %v1805_v54 = vsub.f32 %v4570_v7, %v1771_v23  ;;  %v1806_v63 = vsub.f32 %v4575_v13, %v1773_v56  ;;  %v1808_v7 = vsub.f32 %v4591_v26, %v1777_v12  ;;  %v1825_v13 = vmul.f32 %v1809_v0, %v1809_v0 }
 0x2af   : > { %3734 = vmatpush3.bf16.msra.mxu1 %v3733_v20  ;;  %v1818_v20 = vmul.f32 %v1802_v9, %v1802_v9 }
 0x2b0   : > { %3735 = vmatprep.subr.bf16.mxu1 %v5186_v60  ;;  %v1821_v48 = vmul.f32 %v1805_v54, %v1805_v54  ;;  %v1822_v61 = vmul.f32 %v1806_v63, %v1806_v63  ;;  %v1824_v22 = vmul.f32 %v1808_v7, %v1808_v7  ;;  %v2252_v54 = vlaneseq }
 0x2b1   : > { %v3775_v33 = vpack.c.bf16 %v1819_v59, %v1818_v20 }
 0x2b2   : > { %v3781_v43 = vpack.c.bf16 %v1823_v4, %v1822_v61  ;;  %v3784_v26 = vpack.c.bf16 %v1825_v13, %v1824_v22  ;;  %v2253_v63 = vand.u32 127, %v2252_v54 }
 0x2b3   : > { %3737 = vmatpush3.bf16.msra.mxu1 %v3736_v40  ;;  %v1820_v40 = vmul.f32 %v1804_v62, %v1804_v62 }
 0x2b4   : > { %3762 = vmatprep.subr.bf16.mxu1 %v5186_v60  ;;  %vm2257_vm9 = vcmp.eq.s32.totalorder %v2253_v63, 1  ;;  %vm2254_vm10 = vcmp.eq.s32.totalorder %v2253_v63, 0  ;;  %vm2260_vm11 = vcmp.eq.s32.totalorder %v2253_v63, 2  ;;  %vm2263_vm12 = vcmp.eq.s32.totalorder %v2253_v63, 3 }
 0x2b5   : > { %v3778_v49 = vpack.c.bf16 %v1821_v48, %v1820_v40  ;;  %v1731_v15 = vpop.f32.mrb[8].mxu0  ;;  %vm2266_vm13 = vcmp.eq.s32.totalorder %v2253_v63, 4  ;;  %vm2269_vm14 = vcmp.eq.s32.totalorder %v2253_v63, 5  ;;  %vm2272_vm15 = vcmp.eq.s32.totalorder %v2253_v63, 6 }
 0x2b6   : > { %3222 = vmatmul.mubr.f32.vlgmr.msra.gmra.mrb[20].mxu1 %v5188_v11  ;;  %v1736_v42 = vsel %vm1735_vm6, %v1731_v15, 0.0  ;;  %v3258_v37 = vpop.f32.mrb[9].mxu0 }
 0x2b7   : > { %3764 = vmatpush3.bf16.msra.mxu1 %v3763_v21  ;;  %3291 = vmatprep.mubr.msk.f32.mxu1 %vm3980_vm0, %v5189_v2  ;;  %v5195_v21 = vpack.c.bf16 %v5193_v17, %v5194_v27 }
 0x2b8   : > { %3765 = vmatprep.subr.bf16.mxu1 %v5186_v60  ;;  %1737 = vadd.xlane.f32.xlu1 %v1736_v42 }
 0x2bb   : > { %3767 = vmatpush3.bf16.msra.mxu1 %v3766_v46  ;;  %v5198_v46 = vpack.c.bf16 %v5196_v47, %v5197_v55 }
 0x2bc   : > { %3768 = vmatprep.subr.bf16.mxu1 %v5186_v60 }
 0x2bf   : > { %3770 = vmatpush3.bf16.msra.mxu1 %v3769_v38 }
 0x2c0   : > { %3771 = vmatprep.subr.bf16.mxu1 %v5186_v60 }
 0x2c3   : > { %3773 = vmatpush3.bf16.msra.mxu1 %v3772_v45 }
 0x2c4   : > { %3774 = vmatprep.subr.bf16.mxu1 %v5186_v60 }
 0x2c7   : > { %3776 = vmatpush3.bf16.msra.mxu1 %v3775_v33 }
 0x2c8   : > { %3777 = vmatprep.subr.bf16.mxu1 %v5186_v60 }
 0x2cb   : > { %3779 = vmatpush3.bf16.msra.mxu1 %v3778_v49 }
 0x2cc   : > { %3780 = vmatprep.subr.bf16.mxu1 %v5186_v60 }
 0x2cf   : > { %3782 = vmatpush3.bf16.msra.mxu1 %v3781_v43 }
 0x2d0   : > { %3783 = vmatprep.subr.bf16.mxu1 %v5186_v60 }
 0x2d3   : > { %3786 = vmatpush3.bf16.msk.msra.mxu1 %vm4939_vm4, %v3784_v26 }
 0x2d4   : > { %3812 = vmatprep.subr.bf16.mxu1 %v5186_v60 }
 0x2d6   : > { %3292 = vmatmul.mubr.msk.f32.vlgmr.msra.gmra.mrb[22].mxu1 %vm1558_vm5, %v5188_v11 }
 0x2d7   : > { %3814 = vmatpush3.bf16.msra.mxu1 %v5195_v21  ;;  %3361 = vmatprep.mubr.msk.f32.mxu1 %vm3980_vm0, %v5189_v2  ;;  %v5205_v2 = vpack.c.bf16 %v4869_v41, %v4862_v32 }
 0x2d8   : > { %3815 = vmatprep.subr.bf16.mxu1 %v5186_v60 }
 0x2db   : > { %3817 = vmatpush3.bf16.msra.mxu1 %v5198_v46 }
 0x2dc   : > { %3818 = vmatprep.subr.bf16.mxu1 %v5186_v60 }
 0x2df   : > { %3820 = vmatpush3.bf16.msra.mxu1 %v5201_v50 }
 0x2e0   : > { %3821 = vmatprep.subr.bf16.mxu1 %v5186_v60 }
 0x2e3   : > { %3823 = vmatpush3.bf16.msra.mxu1 %v5204_v18 }
 0x2e4   : > { %3824 = vmatprep.subr.bf16.mxu1 %v5186_v60 }
 0x2e7   : > { %3826 = vmatpush3.bf16.msra.mxu1 %v5205_v2 }
 0x2e8   : > { %3827 = vmatprep.subr.bf16.mxu1 %v5186_v60 }
 0x2eb   : > { %3829 = vmatpush3.bf16.msra.mxu1 %v3828_v31 }
 0x2ec   : > { %3830 = vmatprep.subr.bf16.mxu1 %v5186_v60 }
 0x2ef   : > { %3832 = vmatpush3.bf16.msra.mxu1 %v3831_v14 }
 0x2f0   : > { %3833 = vmatprep.subr.bf16.mxu1 %v5186_v60 }
 0x2f3   : > { %3836 = vmatpush3.bf16.msk.msra.mxu1 %vm3835_vm8, %v3834_v19 }
 0x2f6   : > { %3362 = vmatmul.mubr.msk.f32.vlgmr.msra.gmra.mrb[24].mxu1 %vm1735_vm6, %v5188_v11 }
 0x345   : > { %v1738_v52 = vpop.xlane.xlu1 %1737 }
 0x346   : > { %v1739_v6 = vrot.slane %v1738_v52, 4 }
 0x348   : > { %v1740_v24 = vadd.f32 %v1739_v6, %v1738_v52 }
 0x349   : > { %v1283_v29 = vpop.f32.mrb[16].mxu1 }
 0x34a   : > { %v3153_v32 = vpop.f32.mrb[17].mxu1  ;;  %v1287_v41 = vsel %vm1213_vm2, %v1283_v29, 0.0  ;;  %v1741_v10 = vrot.slane %v1740_v24, 2 }
 0x34b   : > { %1288 = vadd.xlane.f32.xlu0 %v1287_v41 }
 0x34c   : > { %v1742_v20 = vadd.f32 %v1741_v10, %v1740_v24 }
 0x34e   : > { %v1743_v56 = vrot.slane %v1742_v20, 1 }
 0x34f   : > { %v2059_v34 = vpop.f32.mrb[10].mxu0 }
 0x350   : > { %v3328_v31 = vpop.f32.mrb[11].mxu0  ;;  %v1744_v0 = vadd.f32 %v1743_v56, %v1742_v20 }
 0x352   : > { %v1745_v22 = vmul.f32 0.125, %v1744_v0 }
 0x354   : > { %v2258_v50 = vsel %vm2257_vm9, %v1745_v22, 0.0 }
 0x369   : > { %v1379_v3 = vpop.f32.mrb[18].mxu1 }
 0x36a   : > { %v3188_v51 = vpop.f32.mrb[19].mxu1 }
 0x389   : > { %v1554_v14 = vpop.f32.mrb[20].mxu1 }
 0x38a   : > { %v3223_v60 = vpop.f32.mrb[21].mxu1  ;;  %v1559_v39 = vsel %vm1558_vm5, %v1554_v14, 0.0 }
 0x38b   : > { %1560 = vadd.xlane.f32.xlu1 %v1559_v39 }
 0x38f   : > { %1383 = vadd.xlane.f32.xlu1 %v1379_v3 }
 0x3a9   : > { %v1897_v28 = vpop.f32.mrb[22].mxu1 }
 0x3aa   : > { %v3293_v44 = vpop.f32.mrb[23].mxu1  ;;  %v1901_v58 = vsel %vm1558_vm5, %v1897_v28, 0.0 }
 0x3c9   : > { %v2239_v19 = vpop.f32.mrb[24].mxu1 }
 0x3ca   : > { %2243 = vadd.xlane.f32.xlu0 %v2239_v19  ;;  %v3363_v11 = vpop.f32.mrb[25].mxu1 }
 0x3ce   : > { %1902 = vadd.xlane.f32.xlu0 %v1901_v58 }
 0x3d2   : > { %2063 = vadd.xlane.f32.xlu0 %v2059_v34 }
 0x3d8   : > { %v1289_v9 = vpop.xlane.xlu0 %1288 }
 0x3d9   : > { %v1290_v38 = vrot.slane %v1289_v9, 4 }
 0x3db   : > { %v1291_v53 = vadd.f32 %v1290_v38, %v1289_v9 }
 0x3dd   : > { %v1292_v25 = vrot.slane %v1291_v53, 2 }
 0x3df   : > { %v1293_v59 = vadd.f32 %v1292_v25, %v1291_v53 }
 0x3e1   : > { %v1294_v5 = vrot.slane %v1293_v59, 1 }
 0x3e3   : > { %v1295_v7 = vadd.f32 %v1294_v5, %v1293_v59 }
 0x3e5   : > { %v1296_v43 = vmul.f32 0.125, %v1295_v7 }
 0x3e7   : > { %v2255_v35 = vsel %vm2254_vm10, %v1296_v43, 0.0 }
 0x3e8   : > { %v2259_v3 = vadd.f32 %v2258_v50, %v2255_v35 }
 0x418   : > { %v1561_v57 = vpop.xlane.xlu1 %1560 }
 0x419   : > { %v1562_v23 = vrot.slane %v1561_v57, 4 }
 0x41b   : > { %v1563_v45 = vadd.f32 %v1562_v23, %v1561_v57 }
 0x41c   : > { %v1384_v1 = vpop.xlane.xlu1 %1383 }
 0x41d   : > { %v1385_v62 = vrot.slane %v1384_v1, 4  ;;  %v1564_v12 = vrot.slane %v1563_v45, 2 }
 0x41f   : > { %v1386_v40 = vadd.f32 %v1385_v62, %v1384_v1  ;;  %v1565_v49 = vadd.f32 %v1564_v12, %v1563_v45 }
 0x421   : > { %v1387_v4 = vrot.slane %v1386_v40, 2  ;;  %v1566_v26 = vrot.slane %v1565_v49, 1 }
 0x423   : > { %v1388_v27 = vadd.f32 %v1387_v4, %v1386_v40  ;;  %v1567_v30 = vadd.f32 %v1566_v26, %v1565_v49 }
 0x425   : > { %v1389_v18 = vrot.slane %v1388_v27, 1  ;;  %v1568_v51 = vmul.f32 0.125, %v1567_v30 }
 0x427   : > { %v1390_v14 = vadd.f32 %v1389_v18, %v1388_v27  ;;  %v2267_v58 = vsel %vm2266_vm13, %v1568_v51, 0.0 }
 0x429   : > { %v1391_v52 = vmul.f32 0.125, %v1390_v14 }
 0x42b   : > { %v2273_v53 = vsel %vm2272_vm15, %v1391_v52, 0.0 }
 0x457   : > { %v2244_v33 = vpop.xlane.xlu0 %2243 }
 0x458   : > { %v2245_v48 = vrot.slane %v2244_v33, 4 }
 0x45a   : > { %v2246_v8 = vadd.f32 %v2245_v48, %v2244_v33 }
 0x45b   : > { %v1903_v61 = vpop.xlane.xlu0 %1902 }
 0x45c   : > { %v2247_v15 = vrot.slane %v2246_v8, 2  ;;  %v1904_v42 = vrot.slane %v1903_v61, 4 }
 0x45e   : > { %v2248_v37 = vadd.f32 %v2247_v15, %v2246_v8  ;;  %v1905_v13 = vadd.f32 %v1904_v42, %v1903_v61 }
 0x45f   : > { %v2064_v17 = vpop.xlane.xlu0 %2063 }
 0x460   : > { %v2249_v21 = vrot.slane %v2248_v37, 1  ;;  %v1906_v47 = vrot.slane %v1905_v13, 2  ;;  %v2065_v55 = vrot.slane %v2064_v17, 4 }
 0x462   : > { %v2250_v46 = vadd.f32 %v2249_v21, %v2248_v37  ;;  %v1907_v36 = vadd.f32 %v1906_v47, %v1905_v13  ;;  %v2066_v16 = vadd.f32 %v2065_v55, %v2064_v17 }
 0x464   : > { %v2251_v2 = vmul.f32 0.125, %v2250_v46  ;;  %v1908_v29 = vrot.slane %v1907_v36, 1  ;;  %v2067_v32 = vrot.slane %v2066_v16, 2 }
 0x466   : > { %v2261_v41 = vsel %vm2260_vm11, %v2251_v2, 0.0  ;;  %v1909_v34 = vadd.f32 %v1908_v29, %v1907_v36  ;;  %v2068_v31 = vadd.f32 %v2067_v32, %v2066_v16 }
 0x467   : > { %v2262_v28 = vadd.f32 %v2261_v41, %v2259_v3 }
 0x468   : > { %v1910_v60 = vmul.f32 0.125, %v1909_v34  ;;  %v2069_v39 = vrot.slane %v2068_v31, 1 }
 0x46a   : > { %v2264_v44 = vsel %vm2263_vm12, %v1910_v60, 0.0  ;;  %v2070_v19 = vadd.f32 %v2069_v39, %v2068_v31 }
 0x46b   : > { %v2265_v11 = vadd.f32 %v2264_v44, %v2262_v28 }
 0x46c   : > { %v2071_v9 = vmul.f32 0.125, %v2070_v19 }
 0x46d   : > { %v2268_v6 = vadd.f32 %v2267_v58, %v2265_v11 }
 0x46e   : > { %v2270_v38 = vsel %vm2269_vm14, %v2071_v9, 0.0 }
 0x46f   : > { %v2271_v24 = vadd.f32 %v2270_v38, %v2268_v6 }
 0x471   : > { %v2274_v57 = vadd.f32 %v2273_v53, %v2271_v24 }
 0x473   : > { %2275 = vst [vmem:[%s204_s7] sm:$0x1] %v2274_v57 }
 0x474   : > { %3927 = shalt.err (!%p3924_p3)
}
 0x475   : > { %s3928_s22 = scalar_lea.hbm %s5112_s6, 16  ;;  %s3932_s5 = scalar_lea.hbm %s5158_s4, 32 }
 0x476   : > { %p3929_p4 = scmp.ne.s32.totalorder %s5112_s6, %s3928_s22  ;;  %p3933_p9 = scmp.lt.u32.totalorder %s5112_s6, %s5158_s4 }
 0x477   : > { %p3934_p10 = scmp.lt.u32.totalorder %s3932_s5, %s3928_s22  ;;  %p3936_p12 = scmp.lt.u32.totalorder %s3928_s22, %s5112_s6 }
 0x478   : > { %p3930_p7 = pnand %p3929_p4, %p4048_p5 }
 0x479   : > { %p3935_p11 = por %p3934_p10, %p3933_p9 }
 0x47a   : > { %p3931_p8 = pneg %p3930_p7 }
 0x47b   : > { %p3937_p13 = por %p3936_p12, %p3935_p11 }
 0x47d   : > { %p3938_p0 = pnand %p3937_p13, %p3931_p8 }
 0x47f   : > { %3941 = shalt.err (!%p3938_p0)
}
 0x480   : > { %3853 = dma.vmem_to_hbm [thread:$0]  (%p4048_p5), %s5114_s8, 16, %s5112_s6, %s2277_s12  }
 0x481 PF: > { %p3859_p1 = scmp.ge.s32.totalorder %s3976_s18, 2  ;;  %s2301_s9 = sand.u32 1, %s3964_s15  }
 0x482   : > { %s2302_s30 = scalar_lea.sflag [#allocation3], %s2301_s9 }
 0x483   : > { %p3856_p2 = pnand %p3859_p1, %p4052_p6 }
 0x485   : > { %3959 = dma.done.wait (!%p3856_p2), %s2302_s30, 16  }
 0x486   : > { %3961 = vsyncadd (!%p3856_p2), %s2302_s30, 4294967280  ;;  %p14_p3 = scmp.ge.s32.totalorder %s4035_s21, 4   ;;  %s5206_s15 = smov %s3968_s16 }
 0x487   : > { %s5207_s16 = smov %s3972_s17  ;;  %s5208_s17 = smov %s4046_s24 }
 0x488   : > { %s5209_s18 = smov %s4035_s21  ;;  %16 = sbr.rel (!%p14_p3) target bundleno = 3 (0x3), region = 82 }
 0x48f   :  { %2306 = vsyncpa [#allocation3], 1 }
 0x490   :  { %2308 = vsyncpa [#allocation3 + $0x1], 1 }

</bundles_post_ra>
